<compile_context>
chip_gen: v7x
topology: tpu7x:2x2x1
jax: 0.10.0
libtpu: 0.0.40
codegen_flags: <defaults>
</compile_context>

<pallas_src>
import jax
import jax.numpy as jnp
from jax import lax
from jax.experimental import pallas as pl
from jax.experimental.pallas import tpu as pltpu

# ----------------------------- hyper-parameters ------------------------------
NUM_MOVIES = 64
INPUT_DIM = 8
SEQ_LEN = 8
EMBEDDING_DIM = 32
NUM_HEADS = 4
NUM_LAYERS = 2
DROPOUT_RATE = 0.1          # identity at inference (eval mode)
BATCH = 2

HEAD_DIM = EMBEDDING_DIM // NUM_HEADS
FF_DIM = EMBEDDING_DIM * 4
LN_EPS = 1e-5
LANES = 128

# --------------------- packed weight-slab row layout -------------------------
# Global section
_R_WIN = 0            # rows 0:8,   cols 0:32   w_in (INPUT_DIM, E)
_R_INBIAS = 8         # row  8,     cols 0:32   b_in + pos_emb[:, -1]
_R_BOUT = 9           # row  9,     cols 0:64   b_out (zero-padded to 128)
_R_WOUT = 16          # rows 16:48, cols 0:64   w_out (E, M) (zero-padded to 128)
ROWS_GLOBAL = 48
# Per-layer section (stride ROWS_PER_LAYER, 8-aligned)
_R_ATTN = 0           # 32 rows, cols: [Wq | Wk | Wv | Wo]   (E, 128)
_R_FF1 = 32           # 32 rows, w_ff1 (E, FF)                (E, 128)
_R_FF2T = 64          # 32 rows, w_ff2^T (E, FF)              (E, 128)
_R_VEC_QKVO = 96      # 1 row:  [b_q | b_k | b_v | b_o]
_R_VEC_BFF1 = 97      # 1 row:  b_ff1 (FF)
_R_VEC_LN = 98        # 1 row:  [ln1_g | ln1_b | ln2_g | ln2_b]
_R_VEC_BFF2 = 99      # 1 row:  [b_ff2 | 0...]
ROWS_PER_LAYER = 104
WMAT_ROWS = ROWS_GLOBAL + NUM_LAYERS * ROWS_PER_LAYER        # 256


# ------------------------------ kernel helpers -------------------------------
def _erf(x):
    # TODO(synk): lax.erf lowering in Mosaic is version-dependent; use an
    # Abramowitz-Stegun 7.1.26 polynomial (|err| <= 1.5e-7) instead of erf_p.
    a1, a2, a3, a4, a5 = 0.254829592, -0.284496736, 1.421413741, -1.453152027, 1.061405429
    p = 0.3275911
    ax = jnp.abs(x)
    t = 1.0 / (1.0 + p * ax)
    poly = ((((a5 * t + a4) * t + a3) * t + a2) * t + a1) * t
    y = 1.0 - poly * jnp.exp(-ax * ax)
    return jnp.where(x >= 0.0, y, -y)


def _gelu_exact(x):
    # PyTorch activation='gelu' uses the exact erf formulation.
    return 0.5 * x * (1.0 + _erf(x * 0.7071067811865476))


def _layer_norm(x, g, b):
    mu = jnp.mean(x, axis=-1, keepdims=True)
    xc = x - mu
    var = jnp.mean(xc * xc, axis=-1, keepdims=True)
    return xc * lax.rsqrt(var + LN_EPS) * g + b


def _swap_rows2(x):
    # Swap the two sublane rows of a (2, n) value (token 0 <-> token 1).
    return jnp.concatenate([x[1:2, :], x[0:1, :]], axis=0)


# --------------------------------- kernel ------------------------------------
def transformer_rec_kernel(feat_ref, wmat_ref, out_ref):
    # feat_ref: (B, INPUT_DIM)   last sequence position
    # wmat_ref: (WMAT_ROWS, 128) packed lane-dense weight slab
    # out_ref:  (B, 128)         lane-dense logits (cols 0:NUM_MOVIES valid)
    B = feat_ref.shape[0]
    E = EMBEDDING_DIM
    f32 = jnp.float32
    scale = 1.0 / float(HEAD_DIM) ** 0.5

    # ---- input projection + (b_in + pos_emb[:, -1]) ----
    w_in = wmat_ref[_R_WIN:_R_WIN + INPUT_DIM, 0:E]                     # (D, E)
    in_bias = wmat_ref[_R_INBIAS:_R_INBIAS + 1, 0:E]                    # (1, E)
    h = jnp.dot(feat_ref[...], w_in, preferred_element_type=f32) + in_bias   # (B, E)

    # ---- 0/1 head-pooling (E,H) and head-expansion (H,E) matrices ----
    # Built once per call from iota (VPU only, no DMA, no grid so no re-exec).
    e_col = lax.broadcasted_iota(jnp.int32, (E, NUM_HEADS), 0)
    h_col = lax.broadcasted_iota(jnp.int32, (E, NUM_HEADS), 1) * HEAD_DIM
    pool = jnp.where((e_col >= h_col) & (e_col < h_col + HEAD_DIM), 1.0, 0.0)
    e_row = lax.broadcasted_iota(jnp.int32, (NUM_HEADS, E), 1)
    h_row = lax.broadcasted_iota(jnp.int32, (NUM_HEADS, E), 0) * HEAD_DIM
    expand = jnp.where((e_row >= h_row) & (e_row < h_row + HEAD_DIM), 1.0, 0.0)

    # TODO(synk): kernel is specialized to B == 2 (the pairwise softmax == sigmoid
    # shortcut and the row swap); a general-B softmax path is not emitted here.
    for l in range(NUM_LAYERS):
        off = ROWS_GLOBAL + l * ROWS_PER_LAYER

        # ---- multi-head self-attention over the B axis (2 tokens) ----
        attn_w = wmat_ref[off + _R_ATTN:off + _R_ATTN + E, :]           # (E,128) [Wq|Wk|Wv|Wo]
        b_qkvo = wmat_ref[off + _R_VEC_QKVO:off + _R_VEC_QKVO + 1, :]   # (1,128) [bq|bk|bv|bo]

        # One fused MXU call: [q|k|v|junk] (+ biases); lane slices split heads' q/k/v.
        qkv = jnp.dot(h, attn_w, preferred_element_type=f32) + b_qkvo   # (B,128)
        q = qkv[:, 0:E]
        k = qkv[:, E:2 * E]
        v = qkv[:, 2 * E:3 * E]

        # Row-swapped k/v via one sublane swap of the fused tile (no MXU).
        qkv_sw = _swap_rows2(qkv)
        k_sw = qkv_sw[:, E:2 * E]
        v_sw = qkv_sw[:, 2 * E:3 * E]

        # Per-head scores: self and cross batched into ONE pooling matmul.
        qk_both = jnp.concatenate([q * k, q * k_sw], axis=0)            # (2B, E)
        s_both = jnp.dot(qk_both, pool, preferred_element_type=f32)     # (2B, H)
        d = (s_both[0:B, :] - s_both[B:2 * B, :]) * scale               # (B, H)
        # softmax over {self, other} == stable sigmoid of the scaled score diff
        ed = jnp.exp(-jnp.abs(d))
        p_self = jnp.where(d >= 0.0, 1.0 / (1.0 + ed), ed / (1.0 + ed)) # (B, H)

        p_exp = jnp.dot(p_self, expand, preferred_element_type=f32)     # (B, E)
        o = p_exp * v + (1.0 - p_exp) * v_sw                            # (B, E)
        attn = jnp.dot(o, attn_w[:, 3 * E:4 * E],
                       preferred_element_type=f32) + b_qkvo[:, 3 * E:4 * E]

        ln = wmat_ref[off + _R_VEC_LN:off + _R_VEC_LN + 1, :]           # (1,128)
        h = _layer_norm(h + attn, ln[:, 0:E], ln[:, E:2 * E])

        # ---- feed-forward (exact GELU) ----
        w_ff1 = wmat_ref[off + _R_FF1:off + _R_FF1 + E, :]              # (E, FF)
        b_ff1 = wmat_ref[off + _R_VEC_BFF1:off + _R_VEC_BFF1 + 1, :]    # (1, FF)
        w_ff2t = wmat_ref[off + _R_FF2T:off + _R_FF2T + E, :]           # (E, FF) = w_ff2^T
        b_ff2 = wmat_ref[off + _R_VEC_BFF2:off + _R_VEC_BFF2 + 1, 0:E]  # (1, E)

        ff = _gelu_exact(jnp.dot(h, w_ff1, preferred_element_type=f32) + b_ff1)   # (B, FF)
        ff2 = lax.dot_general(ff, w_ff2t, (((1,), (1,)), ((), ())),
                              preferred_element_type=f32) + b_ff2                  # (B, E)
        h = _layer_norm(h + ff2, ln[:, 2 * E:3 * E], ln[:, 3 * E:4 * E])

    # ---- output projection (lane-dense 128-wide store; cols >= NUM_MOVIES are 0) ----
    w_out = wmat_ref[_R_WOUT:_R_WOUT + E, :]                            # (E, 128)
    b_out = wmat_ref[_R_BOUT:_R_BOUT + 1, :]                            # (1, 128)
    out_ref[...] = jnp.dot(h, w_out, preferred_element_type=f32) + b_out


# -------------------------------- packing -------------------------------------
def pack_params(params):
    """One-time host-side packing into a single lane-dense (WMAT_ROWS, 128) slab."""
    E, FF, L = EMBEDDING_DIM, FF_DIM, NUM_LAYERS
    wmat = jnp.zeros((WMAT_ROWS, LANES), jnp.float32)
    wmat = wmat.at[_R_WIN:_R_WIN + INPUT_DIM, 0:E].set(params["w_in"])
    in_bias = params["b_in"][0] + params["pos"][0, SEQ_LEN - 1]          # (E,)
    wmat = wmat.at[_R_INBIAS, 0:E].set(in_bias)
    wmat = wmat.at[_R_BOUT, 0:NUM_MOVIES].set(params["b_out"][0])
    wmat = wmat.at[_R_WOUT:_R_WOUT + E, 0:NUM_MOVIES].set(params["w_out"])
    for l in range(L):
        off = ROWS_GLOBAL + l * ROWS_PER_LAYER
        wmat = wmat.at[off + _R_ATTN:off + _R_ATTN + E, 0:3 * E].set(params["w_qkv"][l])
        wmat = wmat.at[off + _R_ATTN:off + _R_ATTN + E, 3 * E:4 * E].set(params["w_o"][l])
        wmat = wmat.at[off + _R_FF1:off + _R_FF1 + E, 0:FF].set(params["w_ff1"][l])
        wmat = wmat.at[off + _R_FF2T:off + _R_FF2T + E, 0:FF].set(params["w_ff2"][l].T)
        wmat = wmat.at[off + _R_VEC_QKVO, 0:3 * E].set(params["b_qkv"][l, 0])
        wmat = wmat.at[off + _R_VEC_QKVO, 3 * E:4 * E].set(params["b_o"][l, 0])
        wmat = wmat.at[off + _R_VEC_BFF1, 0:FF].set(params["b_ff1"][l, 0])
        wmat = wmat.at[off + _R_VEC_LN, 0:E].set(params["ln1_g"][l, 0])
        wmat = wmat.at[off + _R_VEC_LN, E:2 * E].set(params["ln1_b"][l, 0])
        wmat = wmat.at[off + _R_VEC_LN, 2 * E:3 * E].set(params["ln2_g"][l, 0])
        wmat = wmat.at[off + _R_VEC_LN, 3 * E:4 * E].set(params["ln2_b"][l, 0])
        wmat = wmat.at[off + _R_VEC_BFF2, 0:E].set(params["b_ff2"][l, 0])
    return wmat


# -------------------------------- wrapper -------------------------------------
@jax.jit
def transformer_rec_forward(features, wmat):
    B, S, _ = features.shape
    # Kernel specialization: B == 2 (attention axis) and S == SEQ_LEN (pos baked).
    assert B == BATCH and S == SEQ_LEN, "kernel is specialized to (B=2, S=SEQ_LEN)"
    # Only position S-1 influences output[:, -1] (attention mixes the B axis only).
    feat_last = features[:, -1, :].astype(jnp.float32)                  # (B, D)

    flops = 2 * (B * INPUT_DIM * EMBEDDING_DIM
                 + NUM_LAYERS * (B * EMBEDDING_DIM * 4 * EMBEDDING_DIM      # fused QKV+Wo tile
                                 + 2 * B * EMBEDDING_DIM * NUM_HEADS        # batched pooling
                                 + B * NUM_HEADS * EMBEDDING_DIM            # head expansion
                                 + B * EMBEDDING_DIM * EMBEDDING_DIM        # out projection
                                 + 2 * B * EMBEDDING_DIM * FF_DIM)          # ff1 + ff2
                 + B * EMBEDDING_DIM * LANES)                                # output (padded)
    transcendentals = NUM_LAYERS * B * (FF_DIM + NUM_HEADS)
    n_bytes = (feat_last.size + wmat.size + B * LANES) * 4

    vmem = pl.BlockSpec(memory_space=pltpu.MemorySpace.VMEM)
    padded = pl.pallas_call(
        transformer_rec_kernel,
        out_shape=jax.ShapeDtypeStruct((B, LANES), jnp.float32),
        in_specs=[vmem, vmem],
        out_specs=vmem,
        cost_estimate=pl.CostEstimate(flops=flops, transcendentals=transcendentals,
                                      bytes_accessed=n_bytes),
    )(feat_last, wmat)
    return padded[:, :NUM_MOVIES]


# ------------------------ deterministic parameter init ------------------------
def init_params(key):
    E, L, M, D, FF, S = EMBEDDING_DIM, NUM_LAYERS, NUM_MOVIES, INPUT_DIM, FF_DIM, SEQ_LEN
    ks = jax.random.split(key, 8)
    nrm = lambda k, shape: jax.random.normal(k, shape, jnp.float32) * 0.02
    zeros = lambda shape: jnp.zeros(shape, jnp.float32)
    ones = lambda shape: jnp.ones(shape, jnp.float32)
    return dict(
        w_in=nrm(ks[0], (D, E)), b_in=zeros((1, E)),
        pos=jax.random.normal(ks[1], (1, S, E), jnp.float32),             # torch layout (1,S,E)
        w_qkv=nrm(ks[2], (L, E, 3 * E)), b_qkv=zeros((L, 1, 3 * E)),
        w_o=nrm(ks[3], (L, E, E)), b_o=zeros((L, 1, E)),
        ln1_g=ones((L, 1, E)), ln1_b=zeros((L, 1, E)),
        w_ff1=nrm(ks[4], (L, E, FF)), b_ff1=zeros((L, 1, FF)),
        w_ff2=nrm(ks[5], (L, FF, E)), b_ff2=zeros((L, 1, E)),
        ln2_g=ones((L, 1, E)), ln2_b=zeros((L, 1, E)),
        w_out=nrm(ks[6], (E, M)), b_out=zeros((1, M)),
    )


# ------------------------ pure-JAX reference (torch layout) -------------------
def reference_forward(features, params):
    E, H, Dh, L = EMBEDDING_DIM, NUM_HEADS, HEAD_DIM, NUM_LAYERS

    def layer_norm(v, g, b):
        mu = v.mean(-1, keepdims=True)
        var = ((v - mu) ** 2).mean(-1, keepdims=True)
        return (v - mu) / jnp.sqrt(var + LN_EPS) * g + b

    x = features @ params["w_in"] + params["b_in"][0]                     # (B, S, E)
    x = x + params["pos"][:, :features.shape[1], :]
    # nn.TransformerEncoder default batch_first=False: attention mixes dim 0.
    for l in range(L):
        qkv = x @ params["w_qkv"][l] + params["b_qkv"][l, 0]
        q, k, v = qkv[..., :E], qkv[..., E:2 * E], qkv[..., 2 * E:]
        B, S = q.shape[0], q.shape[1]
        qh = q.reshape(B, S, H, Dh)
        kh = k.reshape(B, S, H, Dh)
        vh = v.reshape(B, S, H, Dh)
        s = jnp.einsum("bshd,cshd->shbc", qh, kh) / jnp.sqrt(float(Dh))
        p = jax.nn.softmax(s, axis=-1)
        o = jnp.einsum("shbc,cshd->bshd", p, vh).reshape(B, S, E)
        attn = o @ params["w_o"][l] + params["b_o"][l, 0]
        x = layer_norm(x + attn, params["ln1_g"][l, 0], params["ln1_b"][l, 0])
        ff = jax.nn.gelu(x @ params["w_ff1"][l] + params["b_ff1"][l, 0], approximate=False)
        ff = ff @ params["w_ff2"][l] + params["b_ff2"][l, 0]
        x = layer_norm(x + ff, params["ln2_g"][l, 0], params["ln2_b"][l, 0])
    return x[:, -1] @ params["w_out"] + params["b_out"][0]


# ----------------------------------- main --------------------------------------
if __name__ == "__main__":
    key = jax.random.PRNGKey(0)
    pkey, xkey = jax.random.split(key)
    params = init_params(pkey)
    wmat = pack_params(params)          # done once, outside the forward pass
    features = jax.random.normal(xkey, (BATCH, SEQ_LEN, INPUT_DIM), jnp.float32)

    logits = transformer_rec_forward(features, wmat)
    logits = jax.block_until_ready(logits)

    ref = reference_forward(features, params)
    assert logits.shape == (BATCH, NUM_MOVIES)
    if not jnp.allclose(logits, ref, atol=5e-4, rtol=5e-3):
        raise AssertionError(
            f"kernel/reference mismatch, max abs diff = {float(jnp.max(jnp.abs(logits - ref)))}"
        )
    print("KERNEL_OK")
</pallas_src>

<mosaic_0001>
module attributes {stable_mosaic.version = 11 : i64} {
  func.func @transformer_rec_kernel(%arg0: memref<2x8xf32, #tpu.memory_space<vmem>>, %arg1: memref<256x128xf32, #tpu.memory_space<vmem>>, %arg2: memref<2x128xf32, #tpu.memory_space<vmem>>) attributes {dimension_semantics = [], scalar_prefetch = 0 : i64, scratch_operands = 0 : i64, tpu.core_type = #tpu.core_type<tc>} {
    %c0 = arith.constant 0 : index
    %c0_0 = arith.constant 0 : index
    %0 = vector.load %arg1[%c0, %c0_0] : memref<256x128xf32, #tpu.memory_space<vmem>>, vector<8x32xf32>
    %c8 = arith.constant 8 : index
    %c0_1 = arith.constant 0 : index
    %1 = vector.load %arg1[%c8, %c0_1] : memref<256x128xf32, #tpu.memory_space<vmem>>, vector<1x32xf32>
    %c0_2 = arith.constant 0 : index
    %c0_3 = arith.constant 0 : index
    %2 = vector.load %arg0[%c0_2, %c0_3] : memref<2x8xf32, #tpu.memory_space<vmem>>, vector<2x8xf32>
    %cst = arith.constant dense<0.000000e+00> : vector<2x32xf32>
    %3 = tpu.matmul %2, %0, %cst {dimension_numbers = #tpu.dot_dimension_numbers<[1], [0], [0], [1], [0, 0, 1, 1], [], []>} : vector<2x8xf32>, vector<8x32xf32>, vector<2x32xf32> -> vector<2x32xf32>
    %4 = vector.broadcast %1 : vector<1x32xf32> to vector<2x32xf32>
    %5 = arith.addf %3, %4 : vector<2x32xf32>
    %6 = tpu.iota {dimensions = array<i32: 0>} : vector<32x4xi32>
    %7 = tpu.iota {dimensions = array<i32: 1>} : vector<32x4xi32>
    %c8_i32 = arith.constant 8 : i32
    %8 = vector.broadcast %c8_i32 : i32 to vector<32x4xi32>
    %9 = arith.muli %7, %8 : vector<32x4xi32>
    %10 = arith.cmpi sge, %6, %9 : vector<32x4xi32>
    %c8_i32_4 = arith.constant 8 : i32
    %11 = vector.broadcast %c8_i32_4 : i32 to vector<32x4xi32>
    %12 = arith.addi %9, %11 : vector<32x4xi32>
    %13 = arith.cmpi slt, %6, %12 : vector<32x4xi32>
    %14 = arith.andi %10, %13 : vector<32x4xi1>
    %cst_5 = arith.constant 1.000000e+00 : f32
    %cst_6 = arith.constant 0.000000e+00 : f32
    %15 = vector.broadcast %cst_5 : f32 to vector<32x4xf32>
    %16 = vector.broadcast %cst_6 : f32 to vector<32x4xf32>
    %17 = arith.select %14, %15, %16 : vector<32x4xi1>, vector<32x4xf32>
    %18 = tpu.iota {dimensions = array<i32: 1>} : vector<4x32xi32>
    %19 = tpu.iota {dimensions = array<i32: 0>} : vector<4x32xi32>
    %c8_i32_7 = arith.constant 8 : i32
    %20 = vector.broadcast %c8_i32_7 : i32 to vector<4x32xi32>
    %21 = arith.muli %19, %20 : vector<4x32xi32>
    %22 = arith.cmpi sge, %18, %21 : vector<4x32xi32>
    %c8_i32_8 = arith.constant 8 : i32
    %23 = vector.broadcast %c8_i32_8 : i32 to vector<4x32xi32>
    %24 = arith.addi %21, %23 : vector<4x32xi32>
    %25 = arith.cmpi slt, %18, %24 : vector<4x32xi32>
    %26 = arith.andi %22, %25 : vector<4x32xi1>
    %cst_9 = arith.constant 1.000000e+00 : f32
    %cst_10 = arith.constant 0.000000e+00 : f32
    %27 = vector.broadcast %cst_9 : f32 to vector<4x32xf32>
    %28 = vector.broadcast %cst_10 : f32 to vector<4x32xf32>
    %29 = arith.select %26, %27, %28 : vector<4x32xi1>, vector<4x32xf32>
    %c48 = arith.constant 48 : index
    %c0_11 = arith.constant 0 : index
    %30 = vector.load %arg1[%c48, %c0_11] : memref<256x128xf32, #tpu.memory_space<vmem>>, vector<32x128xf32>
    %c144 = arith.constant 144 : index
    %c0_12 = arith.constant 0 : index
    %31 = vector.load %arg1[%c144, %c0_12] : memref<256x128xf32, #tpu.memory_space<vmem>>, vector<1x128xf32>
    %cst_13 = arith.constant dense<0.000000e+00> : vector<2x128xf32>
    %32 = tpu.matmul %5, %30, %cst_13 {dimension_numbers = #tpu.dot_dimension_numbers<[1], [0], [0], [1], [0, 0, 1, 1], [], []>} : vector<2x32xf32>, vector<32x128xf32>, vector<2x128xf32> -> vector<2x128xf32>
    %33 = vector.broadcast %31 : vector<1x128xf32> to vector<2x128xf32>
    %34 = arith.addf %32, %33 : vector<2x128xf32>
    %35 = vector.extract_strided_slice %34 {offsets = [0, 0], sizes = [2, 32], strides = [1, 1]} : vector<2x128xf32> to vector<2x32xf32>
    %36 = vector.extract_strided_slice %34 {offsets = [0, 32], sizes = [2, 32], strides = [1, 1]} : vector<2x128xf32> to vector<2x32xf32>
    %37 = vector.extract_strided_slice %34 {offsets = [0, 64], sizes = [2, 32], strides = [1, 1]} : vector<2x128xf32> to vector<2x32xf32>
    %38 = vector.extract_strided_slice %34 {offsets = [1, 0], sizes = [1, 128], strides = [1, 1]} : vector<2x128xf32> to vector<1x128xf32>
    %39 = vector.extract_strided_slice %34 {offsets = [0, 0], sizes = [1, 128], strides = [1, 1]} : vector<2x128xf32> to vector<1x128xf32>
    %40 = tpu.concatenate %38, %39 in 0 : vector<1x128xf32>, vector<1x128xf32> -> vector<2x128xf32>
    %41 = vector.extract_strided_slice %40 {offsets = [0, 32], sizes = [2, 32], strides = [1, 1]} : vector<2x128xf32> to vector<2x32xf32>
    %42 = vector.extract_strided_slice %40 {offsets = [0, 64], sizes = [2, 32], strides = [1, 1]} : vector<2x128xf32> to vector<2x32xf32>
    %43 = arith.mulf %35, %36 : vector<2x32xf32>
    %44 = arith.mulf %35, %41 : vector<2x32xf32>
    %45 = tpu.concatenate %43, %44 in 0 : vector<2x32xf32>, vector<2x32xf32> -> vector<4x32xf32>
    %cst_14 = arith.constant dense<0.000000e+00> : vector<4x4xf32>
    %46 = tpu.matmul %45, %17, %cst_14 {dimension_numbers = #tpu.dot_dimension_numbers<[1], [0], [0], [1], [0, 0, 1, 1], [], []>} : vector<4x32xf32>, vector<32x4xf32>, vector<4x4xf32> -> vector<4x4xf32>
    %47 = vector.extract_strided_slice %46 {offsets = [0, 0], sizes = [2, 4], strides = [1, 1]} : vector<4x4xf32> to vector<2x4xf32>
    %48 = vector.extract_strided_slice %46 {offsets = [2, 0], sizes = [2, 4], strides = [1, 1]} : vector<4x4xf32> to vector<2x4xf32>
    %49 = arith.subf %47, %48 : vector<2x4xf32>
    %cst_15 = arith.constant 0.353553385 : f32
    %50 = vector.broadcast %cst_15 : f32 to vector<2x4xf32>
    %51 = arith.mulf %49, %50 : vector<2x4xf32>
    %52 = math.absf %51 : vector<2x4xf32>
    %cst_16 = arith.constant 0.000000e+00 : f32
    %53 = vector.broadcast %cst_16 : f32 to vector<2x4xf32>
    %54 = arith.subf %53, %52 : vector<2x4xf32>
    %55 = math.exp %54 : vector<2x4xf32>
    %cst_17 = arith.constant 0.000000e+00 : f32
    %56 = vector.broadcast %cst_17 : f32 to vector<2x4xf32>
    %57 = arith.cmpf oge, %51, %56 : vector<2x4xf32>
    %cst_18 = arith.constant 1.000000e+00 : f32
    %58 = vector.broadcast %cst_18 : f32 to vector<2x4xf32>
    %59 = arith.addf %58, %55 : vector<2x4xf32>
    %cst_19 = arith.constant 1.000000e+00 : f32
    %60 = vector.broadcast %cst_19 : f32 to vector<2x4xf32>
    %61 = arith.divf %60, %59 : vector<2x4xf32>
    %cst_20 = arith.constant 1.000000e+00 : f32
    %62 = vector.broadcast %cst_20 : f32 to vector<2x4xf32>
    %63 = arith.addf %62, %55 : vector<2x4xf32>
    %64 = arith.divf %55, %63 : vector<2x4xf32>
    %65 = arith.select %57, %61, %64 : vector<2x4xi1>, vector<2x4xf32>
    %cst_21 = arith.constant dense<0.000000e+00> : vector<2x32xf32>
    %66 = tpu.matmul %65, %29, %cst_21 {dimension_numbers = #tpu.dot_dimension_numbers<[1], [0], [0], [1], [0, 0, 1, 1], [], []>} : vector<2x4xf32>, vector<4x32xf32>, vector<2x32xf32> -> vector<2x32xf32>
    %67 = arith.mulf %66, %37 : vector<2x32xf32>
    %cst_22 = arith.constant 1.000000e+00 : f32
    %68 = vector.broadcast %cst_22 : f32 to vector<2x32xf32>
    %69 = arith.subf %68, %66 : vector<2x32xf32>
    %70 = arith.mulf %69, %42 : vector<2x32xf32>
    %71 = arith.addf %67, %70 : vector<2x32xf32>
    %72 = vector.extract_strided_slice %30 {offsets = [0, 96], sizes = [32, 32], strides = [1, 1]} : vector<32x128xf32> to vector<32x32xf32>
    %cst_23 = arith.constant dense<0.000000e+00> : vector<2x32xf32>
    %73 = tpu.matmul %71, %72, %cst_23 {dimension_numbers = #tpu.dot_dimension_numbers<[1], [0], [0], [1], [0, 0, 1, 1], [], []>} : vector<2x32xf32>, vector<32x32xf32>, vector<2x32xf32> -> vector<2x32xf32>
    %74 = vector.extract_strided_slice %31 {offsets = [0, 96], sizes = [1, 32], strides = [1, 1]} : vector<1x128xf32> to vector<1x32xf32>
    %75 = vector.broadcast %74 : vector<1x32xf32> to vector<2x32xf32>
    %76 = arith.addf %73, %75 : vector<2x32xf32>
    %c146 = arith.constant 146 : index
    %c0_24 = arith.constant 0 : index
    %77 = vector.load %arg1[%c146, %c0_24] : memref<256x128xf32, #tpu.memory_space<vmem>>, vector<1x128xf32>
    %78 = arith.addf %5, %76 : vector<2x32xf32>
    %79 = vector.extract_strided_slice %77 {offsets = [0, 0], sizes = [1, 32], strides = [1, 1]} : vector<1x128xf32> to vector<1x32xf32>
    %80 = vector.extract_strided_slice %77 {offsets = [0, 32], sizes = [1, 32], strides = [1, 1]} : vector<1x128xf32> to vector<1x32xf32>
    %cst_25 = arith.constant dense<0.000000e+00> : vector<2xf32>
    %81 = vector.multi_reduction <add>, %78, %cst_25 [1] : vector<2x32xf32> to vector<2xf32>
    %82 = vector.shape_cast %81 : vector<2xf32> to vector<2x1xf32>
    %cst_26 = arith.constant 3.200000e+01 : f32
    %83 = vector.broadcast %cst_26 : f32 to vector<2x1xf32>
    %84 = arith.divf %82, %83 : vector<2x1xf32>
    %85 = vector.broadcast %84 : vector<2x1xf32> to vector<2x32xf32>
    %86 = arith.subf %78, %85 : vector<2x32xf32>
    %87 = arith.mulf %86, %86 : vector<2x32xf32>
    %cst_27 = arith.constant dense<0.000000e+00> : vector<2xf32>
    %88 = vector.multi_reduction <add>, %87, %cst_27 [1] : vector<2x32xf32> to vector<2xf32>
    %89 = vector.shape_cast %88 : vector<2xf32> to vector<2x1xf32>
    %cst_28 = arith.constant 3.200000e+01 : f32
    %90 = vector.broadcast %cst_28 : f32 to vector<2x1xf32>
    %91 = arith.divf %89, %90 : vector<2x1xf32>
    %cst_29 = arith.constant 9.99999974E-6 : f32
    %92 = vector.broadcast %cst_29 : f32 to vector<2x1xf32>
    %93 = arith.addf %91, %92 : vector<2x1xf32>
    %94 = math.rsqrt %93 : vector<2x1xf32>
    %95 = vector.broadcast %94 : vector<2x1xf32> to vector<2x32xf32>
    %96 = arith.mulf %86, %95 : vector<2x32xf32>
    %97 = vector.broadcast %79 : vector<1x32xf32> to vector<2x32xf32>
    %98 = arith.mulf %96, %97 : vector<2x32xf32>
    %99 = vector.broadcast %80 : vector<1x32xf32> to vector<2x32xf32>
    %100 = arith.addf %98, %99 : vector<2x32xf32>
    %c80 = arith.constant 80 : index
    %c0_30 = arith.constant 0 : index
    %101 = vector.load %arg1[%c80, %c0_30] : memref<256x128xf32, #tpu.memory_space<vmem>>, vector<32x128xf32>
    %c145 = arith.constant 145 : index
    %c0_31 = arith.constant 0 : index
    %102 = vector.load %arg1[%c145, %c0_31] : memref<256x128xf32, #tpu.memory_space<vmem>>, vector<1x128xf32>
    %c112 = arith.constant 112 : index
    %c0_32 = arith.constant 0 : index
    %103 = vector.load %arg1[%c112, %c0_32] : memref<256x128xf32, #tpu.memory_space<vmem>>, vector<32x128xf32>
    %c147 = arith.constant 147 : index
    %c0_33 = arith.constant 0 : index
    %104 = vector.load %arg1[%c147, %c0_33] : memref<256x128xf32, #tpu.memory_space<vmem>>, vector<1x32xf32>
    %cst_34 = arith.constant dense<0.000000e+00> : vector<2x128xf32>
    %105 = tpu.matmul %100, %101, %cst_34 {dimension_numbers = #tpu.dot_dimension_numbers<[1], [0], [0], [1], [0, 0, 1, 1], [], []>} : vector<2x32xf32>, vector<32x128xf32>, vector<2x128xf32> -> vector<2x128xf32>
    %106 = vector.broadcast %102 : vector<1x128xf32> to vector<2x128xf32>
    %107 = arith.addf %105, %106 : vector<2x128xf32>
    %cst_35 = arith.constant 5.000000e-01 : f32
    %108 = vector.broadcast %cst_35 : f32 to vector<2x128xf32>
    %109 = arith.mulf %108, %107 : vector<2x128xf32>
    %cst_36 = arith.constant 0.707106769 : f32
    %110 = vector.broadcast %cst_36 : f32 to vector<2x128xf32>
    %111 = arith.mulf %107, %110 : vector<2x128xf32>
    %112 = math.absf %111 : vector<2x128xf32>
    %cst_37 = arith.constant 0.327591091 : f32
    %113 = vector.broadcast %cst_37 : f32 to vector<2x128xf32>
    %114 = arith.mulf %113, %112 : vector<2x128xf32>
    %cst_38 = arith.constant 1.000000e+00 : f32
    %115 = vector.broadcast %cst_38 : f32 to vector<2x128xf32>
    %116 = arith.addf %115, %114 : vector<2x128xf32>
    %cst_39 = arith.constant 1.000000e+00 : f32
    %117 = vector.broadcast %cst_39 : f32 to vector<2x128xf32>
    %118 = arith.divf %117, %116 : vector<2x128xf32>
    %cst_40 = arith.constant 1.06140542 : f32
    %119 = vector.broadcast %cst_40 : f32 to vector<2x128xf32>
    %120 = arith.mulf %119, %118 : vector<2x128xf32>
    %cst_41 = arith.constant -1.45315206 : f32
    %121 = vector.broadcast %cst_41 : f32 to vector<2x128xf32>
    %122 = arith.addf %120, %121 : vector<2x128xf32>
    %123 = arith.mulf %122, %118 : vector<2x128xf32>
    %cst_42 = arith.constant 1.42141378 : f32
    %124 = vector.broadcast %cst_42 : f32 to vector<2x128xf32>
    %125 = arith.addf %123, %124 : vector<2x128xf32>
    %126 = arith.mulf %125, %118 : vector<2x128xf32>
    %cst_43 = arith.constant -0.284496725 : f32
    %127 = vector.broadcast %cst_43 : f32 to vector<2x128xf32>
    %128 = arith.addf %126, %127 : vector<2x128xf32>
    %129 = arith.mulf %128, %118 : vector<2x128xf32>
    %cst_44 = arith.constant 0.254829586 : f32
    %130 = vector.broadcast %cst_44 : f32 to vector<2x128xf32>
    %131 = arith.addf %129, %130 : vector<2x128xf32>
    %132 = arith.mulf %131, %118 : vector<2x128xf32>
    %cst_45 = arith.constant 0.000000e+00 : f32
    %133 = vector.broadcast %cst_45 : f32 to vector<2x128xf32>
    %134 = arith.subf %133, %112 : vector<2x128xf32>
    %135 = arith.mulf %134, %112 : vector<2x128xf32>
    %136 = math.exp %135 : vector<2x128xf32>
    %137 = arith.mulf %132, %136 : vector<2x128xf32>
    %cst_46 = arith.constant 1.000000e+00 : f32
    %138 = vector.broadcast %cst_46 : f32 to vector<2x128xf32>
    %139 = arith.subf %138, %137 : vector<2x128xf32>
    %cst_47 = arith.constant 0.000000e+00 : f32
    %140 = vector.broadcast %cst_47 : f32 to vector<2x128xf32>
    %141 = arith.cmpf oge, %111, %140 : vector<2x128xf32>
    %cst_48 = arith.constant 0.000000e+00 : f32
    %142 = vector.broadcast %cst_48 : f32 to vector<2x128xf32>
    %143 = arith.subf %142, %139 : vector<2x128xf32>
    %144 = arith.select %141, %139, %143 : vector<2x128xi1>, vector<2x128xf32>
    %cst_49 = arith.constant 1.000000e+00 : f32
    %145 = vector.broadcast %cst_49 : f32 to vector<2x128xf32>
    %146 = arith.addf %145, %144 : vector<2x128xf32>
    %147 = arith.mulf %109, %146 : vector<2x128xf32>
    %cst_50 = arith.constant dense<0.000000e+00> : vector<2x32xf32>
    %148 = tpu.matmul %147, %103, %cst_50 {dimension_numbers = #tpu.dot_dimension_numbers<[1], [1], [0], [0], [0, 0, 1, 0], [], []>} : vector<2x128xf32>, vector<32x128xf32>, vector<2x32xf32> -> vector<2x32xf32>
    %149 = vector.broadcast %104 : vector<1x32xf32> to vector<2x32xf32>
    %150 = arith.addf %148, %149 : vector<2x32xf32>
    %151 = arith.addf %100, %150 : vector<2x32xf32>
    %152 = vector.extract_strided_slice %77 {offsets = [0, 64], sizes = [1, 32], strides = [1, 1]} : vector<1x128xf32> to vector<1x32xf32>
    %153 = vector.extract_strided_slice %77 {offsets = [0, 96], sizes = [1, 32], strides = [1, 1]} : vector<1x128xf32> to vector<1x32xf32>
    %cst_51 = arith.constant dense<0.000000e+00> : vector<2xf32>
    %154 = vector.multi_reduction <add>, %151, %cst_51 [1] : vector<2x32xf32> to vector<2xf32>
    %155 = vector.shape_cast %154 : vector<2xf32> to vector<2x1xf32>
    %cst_52 = arith.constant 3.200000e+01 : f32
    %156 = vector.broadcast %cst_52 : f32 to vector<2x1xf32>
    %157 = arith.divf %155, %156 : vector<2x1xf32>
    %158 = vector.broadcast %157 : vector<2x1xf32> to vector<2x32xf32>
    %159 = arith.subf %151, %158 : vector<2x32xf32>
    %160 = arith.mulf %159, %159 : vector<2x32xf32>
    %cst_53 = arith.constant dense<0.000000e+00> : vector<2xf32>
    %161 = vector.multi_reduction <add>, %160, %cst_53 [1] : vector<2x32xf32> to vector<2xf32>
    %162 = vector.shape_cast %161 : vector<2xf32> to vector<2x1xf32>
    %cst_54 = arith.constant 3.200000e+01 : f32
    %163 = vector.broadcast %cst_54 : f32 to vector<2x1xf32>
    %164 = arith.divf %162, %163 : vector<2x1xf32>
    %cst_55 = arith.constant 9.99999974E-6 : f32
    %165 = vector.broadcast %cst_55 : f32 to vector<2x1xf32>
    %166 = arith.addf %164, %165 : vector<2x1xf32>
    %167 = math.rsqrt %166 : vector<2x1xf32>
    %168 = vector.broadcast %167 : vector<2x1xf32> to vector<2x32xf32>
    %169 = arith.mulf %159, %168 : vector<2x32xf32>
    %170 = vector.broadcast %152 : vector<1x32xf32> to vector<2x32xf32>
    %171 = arith.mulf %169, %170 : vector<2x32xf32>
    %172 = vector.broadcast %153 : vector<1x32xf32> to vector<2x32xf32>
    %173 = arith.addf %171, %172 : vector<2x32xf32>
    %c152 = arith.constant 152 : index
    %c0_56 = arith.constant 0 : index
    %174 = vector.load %arg1[%c152, %c0_56] : memref<256x128xf32, #tpu.memory_space<vmem>>, vector<32x128xf32>
    %c248 = arith.constant 248 : index
    %c0_57 = arith.constant 0 : index
    %175 = vector.load %arg1[%c248, %c0_57] : memref<256x128xf32, #tpu.memory_space<vmem>>, vector<1x128xf32>
    %cst_58 = arith.constant dense<0.000000e+00> : vector<2x128xf32>
    %176 = tpu.matmul %173, %174, %cst_58 {dimension_numbers = #tpu.dot_dimension_numbers<[1], [0], [0], [1], [0, 0, 1, 1], [], []>} : vector<2x32xf32>, vector<32x128xf32>, vector<2x128xf32> -> vector<2x128xf32>
    %177 = vector.broadcast %175 : vector<1x128xf32> to vector<2x128xf32>
    %178 = arith.addf %176, %177 : vector<2x128xf32>
    %179 = vector.extract_strided_slice %178 {offsets = [0, 0], sizes = [2, 32], strides = [1, 1]} : vector<2x128xf32> to vector<2x32xf32>
    %180 = vector.extract_strided_slice %178 {offsets = [0, 32], sizes = [2, 32], strides = [1, 1]} : vector<2x128xf32> to vector<2x32xf32>
    %181 = vector.extract_strided_slice %178 {offsets = [0, 64], sizes = [2, 32], strides = [1, 1]} : vector<2x128xf32> to vector<2x32xf32>
    %182 = vector.extract_strided_slice %178 {offsets = [1, 0], sizes = [1, 128], strides = [1, 1]} : vector<2x128xf32> to vector<1x128xf32>
    %183 = vector.extract_strided_slice %178 {offsets = [0, 0], sizes = [1, 128], strides = [1, 1]} : vector<2x128xf32> to vector<1x128xf32>
    %184 = tpu.concatenate %182, %183 in 0 : vector<1x128xf32>, vector<1x128xf32> -> vector<2x128xf32>
    %185 = vector.extract_strided_slice %184 {offsets = [0, 32], sizes = [2, 32], strides = [1, 1]} : vector<2x128xf32> to vector<2x32xf32>
    %186 = vector.extract_strided_slice %184 {offsets = [0, 64], sizes = [2, 32], strides = [1, 1]} : vector<2x128xf32> to vector<2x32xf32>
    %187 = arith.mulf %179, %180 : vector<2x32xf32>
    %188 = arith.mulf %179, %185 : vector<2x32xf32>
    %189 = tpu.concatenate %187, %188 in 0 : vector<2x32xf32>, vector<2x32xf32> -> vector<4x32xf32>
    %cst_59 = arith.constant dense<0.000000e+00> : vector<4x4xf32>
    %190 = tpu.matmul %189, %17, %cst_59 {dimension_numbers = #tpu.dot_dimension_numbers<[1], [0], [0], [1], [0, 0, 1, 1], [], []>} : vector<4x32xf32>, vector<32x4xf32>, vector<4x4xf32> -> vector<4x4xf32>
    %191 = vector.extract_strided_slice %190 {offsets = [0, 0], sizes = [2, 4], strides = [1, 1]} : vector<4x4xf32> to vector<2x4xf32>
    %192 = vector.extract_strided_slice %190 {offsets = [2, 0], sizes = [2, 4], strides = [1, 1]} : vector<4x4xf32> to vector<2x4xf32>
    %193 = arith.subf %191, %192 : vector<2x4xf32>
    %cst_60 = arith.constant 0.353553385 : f32
    %194 = vector.broadcast %cst_60 : f32 to vector<2x4xf32>
    %195 = arith.mulf %193, %194 : vector<2x4xf32>
    %196 = math.absf %195 : vector<2x4xf32>
    %cst_61 = arith.constant 0.000000e+00 : f32
    %197 = vector.broadcast %cst_61 : f32 to vector<2x4xf32>
    %198 = arith.subf %197, %196 : vector<2x4xf32>
    %199 = math.exp %198 : vector<2x4xf32>
    %cst_62 = arith.constant 0.000000e+00 : f32
    %200 = vector.broadcast %cst_62 : f32 to vector<2x4xf32>
    %201 = arith.cmpf oge, %195, %200 : vector<2x4xf32>
    %cst_63 = arith.constant 1.000000e+00 : f32
    %202 = vector.broadcast %cst_63 : f32 to vector<2x4xf32>
    %203 = arith.addf %202, %199 : vector<2x4xf32>
    %cst_64 = arith.constant 1.000000e+00 : f32
    %204 = vector.broadcast %cst_64 : f32 to vector<2x4xf32>
    %205 = arith.divf %204, %203 : vector<2x4xf32>
    %cst_65 = arith.constant 1.000000e+00 : f32
    %206 = vector.broadcast %cst_65 : f32 to vector<2x4xf32>
    %207 = arith.addf %206, %199 : vector<2x4xf32>
    %208 = arith.divf %199, %207 : vector<2x4xf32>
    %209 = arith.select %201, %205, %208 : vector<2x4xi1>, vector<2x4xf32>
    %cst_66 = arith.constant dense<0.000000e+00> : vector<2x32xf32>
    %210 = tpu.matmul %209, %29, %cst_66 {dimension_numbers = #tpu.dot_dimension_numbers<[1], [0], [0], [1], [0, 0, 1, 1], [], []>} : vector<2x4xf32>, vector<4x32xf32>, vector<2x32xf32> -> vector<2x32xf32>
    %211 = arith.mulf %210, %181 : vector<2x32xf32>
    %cst_67 = arith.constant 1.000000e+00 : f32
    %212 = vector.broadcast %cst_67 : f32 to vector<2x32xf32>
    %213 = arith.subf %212, %210 : vector<2x32xf32>
    %214 = arith.mulf %213, %186 : vector<2x32xf32>
    %215 = arith.addf %211, %214 : vector<2x32xf32>
    %216 = vector.extract_strided_slice %174 {offsets = [0, 96], sizes = [32, 32], strides = [1, 1]} : vector<32x128xf32> to vector<32x32xf32>
    %cst_68 = arith.constant dense<0.000000e+00> : vector<2x32xf32>
    %217 = tpu.matmul %215, %216, %cst_68 {dimension_numbers = #tpu.dot_dimension_numbers<[1], [0], [0], [1], [0, 0, 1, 1], [], []>} : vector<2x32xf32>, vector<32x32xf32>, vector<2x32xf32> -> vector<2x32xf32>
    %218 = vector.extract_strided_slice %175 {offsets = [0, 96], sizes = [1, 32], strides = [1, 1]} : vector<1x128xf32> to vector<1x32xf32>
    %219 = vector.broadcast %218 : vector<1x32xf32> to vector<2x32xf32>
    %220 = arith.addf %217, %219 : vector<2x32xf32>
    %c250 = arith.constant 250 : index
    %c0_69 = arith.constant 0 : index
    %221 = vector.load %arg1[%c250, %c0_69] : memref<256x128xf32, #tpu.memory_space<vmem>>, vector<1x128xf32>
    %222 = arith.addf %173, %220 : vector<2x32xf32>
    %223 = vector.extract_strided_slice %221 {offsets = [0, 0], sizes = [1, 32], strides = [1, 1]} : vector<1x128xf32> to vector<1x32xf32>
    %224 = vector.extract_strided_slice %221 {offsets = [0, 32], sizes = [1, 32], strides = [1, 1]} : vector<1x128xf32> to vector<1x32xf32>
    %cst_70 = arith.constant dense<0.000000e+00> : vector<2xf32>
    %225 = vector.multi_reduction <add>, %222, %cst_70 [1] : vector<2x32xf32> to vector<2xf32>
    %226 = vector.shape_cast %225 : vector<2xf32> to vector<2x1xf32>
    %cst_71 = arith.constant 3.200000e+01 : f32
    %227 = vector.broadcast %cst_71 : f32 to vector<2x1xf32>
    %228 = arith.divf %226, %227 : vector<2x1xf32>
    %229 = vector.broadcast %228 : vector<2x1xf32> to vector<2x32xf32>
    %230 = arith.subf %222, %229 : vector<2x32xf32>
    %231 = arith.mulf %230, %230 : vector<2x32xf32>
    %cst_72 = arith.constant dense<0.000000e+00> : vector<2xf32>
    %232 = vector.multi_reduction <add>, %231, %cst_72 [1] : vector<2x32xf32> to vector<2xf32>
    %233 = vector.shape_cast %232 : vector<2xf32> to vector<2x1xf32>
    %cst_73 = arith.constant 3.200000e+01 : f32
    %234 = vector.broadcast %cst_73 : f32 to vector<2x1xf32>
    %235 = arith.divf %233, %234 : vector<2x1xf32>
    %cst_74 = arith.constant 9.99999974E-6 : f32
    %236 = vector.broadcast %cst_74 : f32 to vector<2x1xf32>
    %237 = arith.addf %235, %236 : vector<2x1xf32>
    %238 = math.rsqrt %237 : vector<2x1xf32>
    %239 = vector.broadcast %238 : vector<2x1xf32> to vector<2x32xf32>
    %240 = arith.mulf %230, %239 : vector<2x32xf32>
    %241 = vector.broadcast %223 : vector<1x32xf32> to vector<2x32xf32>
    %242 = arith.mulf %240, %241 : vector<2x32xf32>
    %243 = vector.broadcast %224 : vector<1x32xf32> to vector<2x32xf32>
    %244 = arith.addf %242, %243 : vector<2x32xf32>
    %c184 = arith.constant 184 : index
    %c0_75 = arith.constant 0 : index
    %245 = vector.load %arg1[%c184, %c0_75] : memref<256x128xf32, #tpu.memory_space<vmem>>, vector<32x128xf32>
    %c249 = arith.constant 249 : index
    %c0_76 = arith.constant 0 : index
    %246 = vector.load %arg1[%c249, %c0_76] : memref<256x128xf32, #tpu.memory_space<vmem>>, vector<1x128xf32>
    %c216 = arith.constant 216 : index
    %c0_77 = arith.constant 0 : index
    %247 = vector.load %arg1[%c216, %c0_77] : memref<256x128xf32, #tpu.memory_space<vmem>>, vector<32x128xf32>
    %c251 = arith.constant 251 : index
    %c0_78 = arith.constant 0 : index
    %248 = vector.load %arg1[%c251, %c0_78] : memref<256x128xf32, #tpu.memory_space<vmem>>, vector<1x32xf32>
    %cst_79 = arith.constant dense<0.000000e+00> : vector<2x128xf32>
    %249 = tpu.matmul %244, %245, %cst_79 {dimension_numbers = #tpu.dot_dimension_numbers<[1], [0], [0], [1], [0, 0, 1, 1], [], []>} : vector<2x32xf32>, vector<32x128xf32>, vector<2x128xf32> -> vector<2x128xf32>
    %250 = vector.broadcast %246 : vector<1x128xf32> to vector<2x128xf32>
    %251 = arith.addf %249, %250 : vector<2x128xf32>
    %cst_80 = arith.constant 5.000000e-01 : f32
    %252 = vector.broadcast %cst_80 : f32 to vector<2x128xf32>
    %253 = arith.mulf %252, %251 : vector<2x128xf32>
    %cst_81 = arith.constant 0.707106769 : f32
    %254 = vector.broadcast %cst_81 : f32 to vector<2x128xf32>
    %255 = arith.mulf %251, %254 : vector<2x128xf32>
    %256 = math.absf %255 : vector<2x128xf32>
    %cst_82 = arith.constant 0.327591091 : f32
    %257 = vector.broadcast %cst_82 : f32 to vector<2x128xf32>
    %258 = arith.mulf %257, %256 : vector<2x128xf32>
    %cst_83 = arith.constant 1.000000e+00 : f32
    %259 = vector.broadcast %cst_83 : f32 to vector<2x128xf32>
    %260 = arith.addf %259, %258 : vector<2x128xf32>
    %cst_84 = arith.constant 1.000000e+00 : f32
    %261 = vector.broadcast %cst_84 : f32 to vector<2x128xf32>
    %262 = arith.divf %261, %260 : vector<2x128xf32>
    %cst_85 = arith.constant 1.06140542 : f32
    %263 = vector.broadcast %cst_85 : f32 to vector<2x128xf32>
    %264 = arith.mulf %263, %262 : vector<2x128xf32>
    %cst_86 = arith.constant -1.45315206 : f32
    %265 = vector.broadcast %cst_86 : f32 to vector<2x128xf32>
    %266 = arith.addf %264, %265 : vector<2x128xf32>
    %267 = arith.mulf %266, %262 : vector<2x128xf32>
    %cst_87 = arith.constant 1.42141378 : f32
    %268 = vector.broadcast %cst_87 : f32 to vector<2x128xf32>
    %269 = arith.addf %267, %268 : vector<2x128xf32>
    %270 = arith.mulf %269, %262 : vector<2x128xf32>
    %cst_88 = arith.constant -0.284496725 : f32
    %271 = vector.broadcast %cst_88 : f32 to vector<2x128xf32>
    %272 = arith.addf %270, %271 : vector<2x128xf32>
    %273 = arith.mulf %272, %262 : vector<2x128xf32>
    %cst_89 = arith.constant 0.254829586 : f32
    %274 = vector.broadcast %cst_89 : f32 to vector<2x128xf32>
    %275 = arith.addf %273, %274 : vector<2x128xf32>
    %276 = arith.mulf %275, %262 : vector<2x128xf32>
    %cst_90 = arith.constant 0.000000e+00 : f32
    %277 = vector.broadcast %cst_90 : f32 to vector<2x128xf32>
    %278 = arith.subf %277, %256 : vector<2x128xf32>
    %279 = arith.mulf %278, %256 : vector<2x128xf32>
    %280 = math.exp %279 : vector<2x128xf32>
    %281 = arith.mulf %276, %280 : vector<2x128xf32>
    %cst_91 = arith.constant 1.000000e+00 : f32
    %282 = vector.broadcast %cst_91 : f32 to vector<2x128xf32>
    %283 = arith.subf %282, %281 : vector<2x128xf32>
    %cst_92 = arith.constant 0.000000e+00 : f32
    %284 = vector.broadcast %cst_92 : f32 to vector<2x128xf32>
    %285 = arith.cmpf oge, %255, %284 : vector<2x128xf32>
    %cst_93 = arith.constant 0.000000e+00 : f32
    %286 = vector.broadcast %cst_93 : f32 to vector<2x128xf32>
    %287 = arith.subf %286, %283 : vector<2x128xf32>
    %288 = arith.select %285, %283, %287 : vector<2x128xi1>, vector<2x128xf32>
    %cst_94 = arith.constant 1.000000e+00 : f32
    %289 = vector.broadcast %cst_94 : f32 to vector<2x128xf32>
    %290 = arith.addf %289, %288 : vector<2x128xf32>
    %291 = arith.mulf %253, %290 : vector<2x128xf32>
    %cst_95 = arith.constant dense<0.000000e+00> : vector<2x32xf32>
    %292 = tpu.matmul %291, %247, %cst_95 {dimension_numbers = #tpu.dot_dimension_numbers<[1], [1], [0], [0], [0, 0, 1, 0], [], []>} : vector<2x128xf32>, vector<32x128xf32>, vector<2x32xf32> -> vector<2x32xf32>
    %293 = vector.broadcast %248 : vector<1x32xf32> to vector<2x32xf32>
    %294 = arith.addf %292, %293 : vector<2x32xf32>
    %295 = arith.addf %244, %294 : vector<2x32xf32>
    %296 = vector.extract_strided_slice %221 {offsets = [0, 64], sizes = [1, 32], strides = [1, 1]} : vector<1x128xf32> to vector<1x32xf32>
    %297 = vector.extract_strided_slice %221 {offsets = [0, 96], sizes = [1, 32], strides = [1, 1]} : vector<1x128xf32> to vector<1x32xf32>
    %cst_96 = arith.constant dense<0.000000e+00> : vector<2xf32>
    %298 = vector.multi_reduction <add>, %295, %cst_96 [1] : vector<2x32xf32> to vector<2xf32>
    %299 = vector.shape_cast %298 : vector<2xf32> to vector<2x1xf32>
    %cst_97 = arith.constant 3.200000e+01 : f32
    %300 = vector.broadcast %cst_97 : f32 to vector<2x1xf32>
    %301 = arith.divf %299, %300 : vector<2x1xf32>
    %302 = vector.broadcast %301 : vector<2x1xf32> to vector<2x32xf32>
    %303 = arith.subf %295, %302 : vector<2x32xf32>
    %304 = arith.mulf %303, %303 : vector<2x32xf32>
    %cst_98 = arith.constant dense<0.000000e+00> : vector<2xf32>
    %305 = vector.multi_reduction <add>, %304, %cst_98 [1] : vector<2x32xf32> to vector<2xf32>
    %306 = vector.shape_cast %305 : vector<2xf32> to vector<2x1xf32>
    %cst_99 = arith.constant 3.200000e+01 : f32
    %307 = vector.broadcast %cst_99 : f32 to vector<2x1xf32>
    %308 = arith.divf %306, %307 : vector<2x1xf32>
    %cst_100 = arith.constant 9.99999974E-6 : f32
    %309 = vector.broadcast %cst_100 : f32 to vector<2x1xf32>
    %310 = arith.addf %308, %309 : vector<2x1xf32>
    %311 = math.rsqrt %310 : vector<2x1xf32>
    %312 = vector.broadcast %311 : vector<2x1xf32> to vector<2x32xf32>
    %313 = arith.mulf %303, %312 : vector<2x32xf32>
    %314 = vector.broadcast %296 : vector<1x32xf32> to vector<2x32xf32>
    %315 = arith.mulf %313, %314 : vector<2x32xf32>
    %316 = vector.broadcast %297 : vector<1x32xf32> to vector<2x32xf32>
    %317 = arith.addf %315, %316 : vector<2x32xf32>
    %c16 = arith.constant 16 : index
    %c0_101 = arith.constant 0 : index
    %318 = vector.load %arg1[%c16, %c0_101] : memref<256x128xf32, #tpu.memory_space<vmem>>, vector<32x128xf32>
    %c9 = arith.constant 9 : index
    %c0_102 = arith.constant 0 : index
    %319 = vector.load %arg1[%c9, %c0_102] : memref<256x128xf32, #tpu.memory_space<vmem>>, vector<1x128xf32>
    %cst_103 = arith.constant dense<0.000000e+00> : vector<2x128xf32>
    %320 = tpu.matmul %317, %318, %cst_103 {dimension_numbers = #tpu.dot_dimension_numbers<[1], [0], [0], [1], [0, 0, 1, 1], [], []>} : vector<2x32xf32>, vector<32x128xf32>, vector<2x128xf32> -> vector<2x128xf32>
    %321 = vector.broadcast %319 : vector<1x128xf32> to vector<2x128xf32>
    %322 = arith.addf %320, %321 : vector<2x128xf32>
    %c0_104 = arith.constant 0 : index
    %c0_105 = arith.constant 0 : index
    %323 = vector.load %arg2[%c0_104, %c0_105] : memref<2x128xf32, #tpu.memory_space<vmem>>, vector<2x128xf32>
    tpu.vector_store %arg2[%c0_104, %c0_105], %322 {strides = array<i32>} : memref<2x128xf32, #tpu.memory_space<vmem>>, vector<2x128xf32>,
    return
  }
}

</mosaic_0001>

<bundles_post_ra>
// kernel: transformer_rec_forward.1
= control target key start
LH: loop header
LB: loop body
LE: loop exit
PB: predicated region body
PF: predicated region fallthrough
CT: control target
= control target key end

     0   :  { %7 = vsyncpa [#allocation3], 0  ;;  %s2068_s0 = inlined_call_operand.vmem [shape: f32[2,8], index: 0, kind: input, shape index: {}]   ;;  %s2069_s1 = inlined_call_operand.hbm [shape: f32[256,128], index: 1, kind: input, shape index: {}]   ;;  %s2070_s2 = inlined_call_operand.hbm [shape: f32[2,128], index: 2, kind: output, shape index: {}]  }
   0x1   :  { %8 = vsyncpa [#allocation4], 0  ;;  %s1844_s9 = smov [#allocation2]   ;;  %s1796_s13 = scalar_lea.hbm %s2069_s1, 4096 }
   0x2   :  { %s16_s10 = sshll.u32 %s1844_s9, 4  ;;  %p1797_p0 = scmp.ne.s32.totalorder %s2069_s1, %s1796_s13  ;;  %s17_s10 = int_to_ptr.vmem [resolvable:$true] %s16_s10 }
   0x3   :  { %p1800_p1 = scmp.lt.u32.totalorder %s1796_s13, %s2069_s1 }
   0x5   :  { %p1802_p2 = pnand %p1800_p1, %p1797_p0 }
   0x7   :  { %1805 = shalt.err (!%p1802_p2)
}
   0x8   :  { %s1806_s18 = scalar_lea.vmem %s17_s10, 4096  ;;  %p1811_p4 = scmp.lt.s32.totalorder %s17_s10, %s17_s10 }
   0x9   :  { %p1807_p3 = scmp.ne.s32.totalorder %s17_s10, %s1806_s18  ;;  %p1812_p5 = scmp.lt.s32.totalorder %s1806_s18, %s1806_s18 }
   0xb   :  { %p1813_p6 = por %p1812_p5, %p1811_p4 }
   0xd   :  { %p1814_p7 = pnand %p1813_p6, %p1807_p3 }
   0xf   :  { %1817 = shalt.err (!%p1814_p7)
}
  0x10   :  { %s1845_s19 = smov 128   ;;  %s1846_s20 = smov 8  }
  0x11   :  { %22 = dma.hbm_to_vmem [thread:$0]  %s2069_s1, 4096, %s17_s10, [#allocation3], %s1845_s19, %s1845_s19, %s1846_s20  }
  0x12   :  { %1840 = dma.done.wait [#allocation3], 4096  }
  0x13   :  { %1841 = vsyncadd [#allocation3], 4294963200  ;;  %v1847_v0 = vmov 0.0   ;;  %vm1848_vm0 = vmmov 0   ;;  %v1849_v1 = vmov 0.0|0.0   ;;  %vm33_vm1 = vcmask 64512  }
  0x14   :  { %1539 = vmatprep.subr.mxu0 %v1847_v0  ;;  %1541 = vmatprep.mubr.msk.f32.mxu0 %vm1848_vm0, %v1847_v0  ;;  %v26_v2 = vld [vmem:[#allocation2] sm:$0xff]  ;;  %v138_v4 = vld [vmem:[#allocation2 + $0x30] sm:$0xff]  ;;  %v139_v5 = vld [vmem:[#allocation2 + $0x38] sm:$0xff]  ;;  %vm147_vm2 = vcmask 261120   ;;  %v107_v16 = vlaneseq  ;;  %v1851_v26 = vmov 1.0|1.0  }
  0x15   :  { %1675 = vmatprep.subr.bf16.mxu1 %v1849_v1  ;;  %1552 = vmatprep.mubr.msk.f32.mxu1 %vm1848_vm0, %v1847_v0  ;;  %v28_v3 = vld [vmem:[%s2068_s0] sm:$0x3]  ;;  %v1676_v6 = vpack.c.bf16 %v139_v5, %v138_v4  ;;  %v141_v8 = vld [vmem:[#allocation2 + $0x48] sm:$0xff]  ;;  %v1752_v10 = vpack.i.bf16 %v139_v5, %v138_v4  ;;  %s1850_s0 = smov 32   ;;  %v1448_v29 = vld [vmem:[#allocation2 + $0x90] ss:$0 sm:$0xff] }
  0x16   :  { %1540 = vmatpush3.msra.mxu0 %v26_v2  ;;  %v140_v7 = vld [vmem:[#allocation2 + $0x40] sm:$0xff]  ;;  %v1446_v11 = vld [vmem:[#allocation2 + $0x8] ss:$0 sm:$0xff]  ;;  %v113_v17 = vand.u32 127, %v107_v16  ;;  %v108_v18 = vshrl.u32 %v107_v16, 7  ;;  %s1852_s1 = smov 64  }
  0x17   :  { %1542 = vmatmul.mubr.msk.f32.vlgmr.msra.gmra.mrb[0].mxu0 %vm33_vm1, %v28_v3  ;;  %1681 = vmatprep.subr.bf16.mxu0 %v1849_v1  ;;  %v1679_v9 = vpack.c.bf16 %v141_v8, %v140_v7  ;;  %v1757_v15 = vpack.i.bf16 %v141_v8, %v140_v7  ;;  %s1853_s25 = smov 96   ;;  %s1854_s26 = smov [#allocation5]  }
  0x18   :  { %1563 = vmatprep.mubr.msk.f32.mxu0 %vm1848_vm0, %v1847_v0  ;;  %1677 = vmatpush3.bf16.msra.mxu1 %v1676_v6  ;;  %v114_v19 = vmul.u32 8, %v113_v17  ;;  %v109_v20 = vadd.s32 8, %v108_v18  ;;  %v110_v24 = vadd.s32 16, %v108_v18  ;;  %v111_v25 = vadd.s32 24, %v108_v18  ;;  %s1437_s27 = sshll.u32 %s1854_s26, 4  ;;  %s1438_s27 = int_to_ptr.vmem [resolvable:$true] %s1437_s27 }
  0x19   :  { %1678 = vmatprep.subr.bf16.mxu1 %v1849_v1  ;;  %1753 = vrot.lane.b32.xlu1 %v1752_v10, %s1850_s0  ;;  %v132_v42 = vmul.u32 8, %v108_v18  ;;  %s1818_s28 = scalar_lea.vmem %s1438_s27, 32  ;;  %p1823_p9 = scmp.lt.s32.totalorder %s1438_s27, %s1438_s27 }
  0x1a   :  { %v119_v21 = vadd.s32 8, %v114_v19  ;;  %vm115_vm3 = vcmp.ge.s32.totalorder %v108_v18, %v114_v19  ;;  %vm116_vm4 = vcmp.ge.s32.totalorder %v109_v20, %v114_v19  ;;  %vm117_vm10 = vcmp.ge.s32.totalorder %v110_v24, %v114_v19  ;;  %p1819_p8 = scmp.ne.s32.totalorder %s1438_s27, %s1818_s28  ;;  %p1824_p10 = scmp.lt.s32.totalorder %s1818_s28, %s1818_s28 }
  0x1b   :  { %vm118_vm11 = vcmp.ge.s32.totalorder %v111_v25, %v114_v19  ;;  %v134_v43 = vadd.s32 8, %v132_v42 }
  0x1c   :  { %1680 = vmatpush3.bf16.msra.mxu1 %v1679_v9  ;;  %vm120_vm5 = vcmp.lt.s32.totalorder %v108_v18, %v119_v21  ;;  %vm121_vm6 = vcmp.lt.s32.totalorder %v109_v20, %v119_v21  ;;  %vm122_vm12 = vcmp.lt.s32.totalorder %v110_v24, %v119_v21  ;;  %vm123_vm13 = vcmp.lt.s32.totalorder %v111_v25, %v119_v21  ;;  %p1825_p11 = por %p1824_p10, %p1823_p9 }
  0x1d   :  { %1693 = vmatprep.subr.bf16.mxu1 %v1849_v1  ;;  %1758 = vrot.lane.b32.xlu1 %v1757_v15, %s1850_s0  ;;  %vm1904_vm7 = vmand %vm115_vm3, %vm120_vm5  ;;  %vm226_vm3 = vcmask 1040384   ;;  %vm133_vm5 = vcmp.ge.s32.totalorder %v113_v17, %v132_v42 }
  0x1e   :  { %vm1908_vm8 = vmand %vm116_vm4, %vm121_vm6  ;;  %vm240_vm4 = vcmask 1041408   ;;  %vm135_vm6 = vcmp.lt.s32.totalorder %v113_v17, %v134_v43  ;;  %v543_v43 = vld [vmem:[#allocation2 + $0x70] sm:$0xff]  ;;  %p1826_p12 = pnand %p1825_p11, %p1819_p8 }
  0x1f   :  { %vm1682_vm9 = vmpackc.low %vm1908_vm8, %vm1904_vm7 }
  0x20   :  { %1683 = vmatpush3.bf16.msk.msra.mxu0 %vm1682_vm9, %v1851_v26  ;;  %vm1923_vm14 = vmand %vm117_vm10, %vm122_vm12  ;;  %vm334_vm10 = vcmask 1043456   ;;  %vm330_vm12 = vcmask 31744  }
  0x21   :  { %1684 = vmatprep.subr.bf16.mxu0 %v1849_v1  ;;  %vm1927_vm15 = vmand %vm118_vm11, %vm123_vm13 }
  0x22   :  { %vm1685_vm1 = vmpackc.low %vm1927_vm15, %vm1923_vm14 }
  0x23   :  { %vm136_vm11 = vmand %vm133_vm5, %vm135_vm6  ;;  %vm513_vm5 = vcmask 254976  }
  0x24   :  { %1686 = vmatpush3.bf16.msk.msra.mxu0 %vm1685_vm1, %v1851_v26  ;;  %v1953_v44 = vsel %vm136_vm11, 1.0, %v1847_v0 }
  0x25   :  { %1566 = vmatprep.subr.mxu0 %v1847_v0 }
  0x8b   :  { %v1754_v55 = vpop.permute.xlu1 %1753 }
  0x8c   :  { %v1756_v56 = vunpack.i.h.bf16 %v1754_v55  ;;  %v1755_v57 = vunpack.i.l.bf16 %v1754_v55 }
  0x8e   :  { %v1688_v59 = vpack.c.bf16 %v1756_v56, %v1755_v57 }
  0x8f   :  { %v1759_v60 = vpop.permute.xlu1 %1758 }
  0x90   :  { %v1761_v61 = vunpack.i.h.bf16 %v1759_v60  ;;  %v1760_v62 = vunpack.i.l.bf16 %v1759_v60 }
  0x92   :  { %v1691_v3 = vpack.c.bf16 %v1761_v61, %v1760_v62 }
  0xea   :  { %v103_v12 = vpop.f32.mrb[0].mxu0 }
  0xeb   :  { %v1897_v13 = vadd.f32 %v1446_v11, %v103_v12  ;;  %v1543_v14 = vpop.f32.mrb[1].mxu0 }
  0xed   :  { %1553 = vmatmul.mubr.msk.f32.vlgmr.msra.gmra.mrb[0].mxu1 %vm147_vm2, %v1897_v13 }
  0xee   :  { %1590 = vmatprep.mubr.msk.f32.mxu1 %vm1848_vm0, %v1847_v0 }
 0x1c0   :  { %v217_v30 = vpop.f32.mrb[0].mxu1 }
 0x1c1   :  { %v218_v31 = vadd.f32 %v1448_v29, %v217_v30  ;;  %v1554_v32 = vpop.f32.mrb[1].mxu1  ;;  %v539_v30 = vld [vmem:[#allocation2 + $0x58] sm:$0xff] }
 0x1c2   :  { %v1969_v32 = vld [vmem:[#allocation2 + $0x92] ss:$0 sm:$0xff] }
 0x1c3   :  { %v222_v33 = vrot.slane %v218_v31, 1  ;;  %v224_v34 = vrot.slane %v218_v31, 7 }
 0x1c5   :  { %v227_v35 = vsel %vm226_vm3, %v222_v33, %v224_v34  ;;  %v541_v34 = vld [vmem:[#allocation2 + $0x68] sm:$0xff] }
 0x1c6   :  { %413 = vrot.lane.b32.xlu1 %v227_v35, %s1852_s1  ;;  %233 = vrot.lane.b32.xlu0 %v227_v35, %s1853_s25 }
 0x1ca   :  { %228 = vrot.lane.b32.xlu0 %v218_v31, %s1853_s25 }
 0x1ce   :  { %408 = vrot.lane.b32.xlu0 %v218_v31, %s1852_s1 }
 0x1d2   :  { %435 = vrot.lane.b32.xlu0 %v1448_v29, %s1850_s0  ;;  %v538_v29 = vld [vmem:[#allocation2 + $0x50] sm:$0xff] }
 0x1d3   :  { %v1694_v33 = vpack.c.bf16 %v539_v30, %v538_v29 }
 0x1d5   :  { %1695 = vmatpush3.bf16.msra.mxu1 %v1694_v33 }
 0x1d6   :  { %1696 = vmatprep.subr.bf16.mxu1 %v1849_v1 }
 0x238   :  { %v234_v36 = vpop.permute.xlu0 %233  ;;  %v414_v7 = vpop.permute.xlu1 %413 }
 0x239   :  { %v236_v37 = vmul.f32 %v234_v36, %v218_v31 }
 0x23b   :  { %v238_v39 = vrot.slane %v236_v37, 6 }
 0x23c   :  { %v229_v38 = vpop.permute.xlu0 %228 }
 0x23d   :  { %v231_v40 = vmul.f32 %v229_v38, %v218_v31  ;;  %v540_v31 = vld [vmem:[#allocation2 + $0x60] sm:$0xff] }
 0x23e   :  { %v1697_v35 = vpack.c.bf16 %v541_v34, %v540_v31 }
 0x23f   :  { %v241_v41 = vsel %vm240_vm4, %v231_v40, %v238_v39 }
 0x240   :  { %1564 = vmatmul.mubr.msk.f32.vlgmr.msra.gmra.mrb[2].mxu0 %vm147_vm2, %v241_v41  ;;  %v409_v8 = vpop.permute.xlu0 %408  ;;  %1698 = vmatpush3.bf16.msra.mxu1 %v1697_v35  ;;  %v749_v35 = vld [vmem:[#allocation2 + $0xa0] sm:$0xff] }
 0x241   :  { %1568 = vmatprep.mubr.msk.f32.mxu0 %vm1848_vm0, %v1847_v0  ;;  %1567 = vmatpush3.msk.msra.mxu0 %vm334_vm10, %v1953_v44 }
 0x242   :  { %1687 = vmatprep.subr.bf16.mxu0 %v1849_v1  ;;  %1705 = vmatprep.subr.bf16.mxu1 %v1849_v1 }
 0x244   :  { %v436_v12 = vpop.permute.xlu0 %435 }
 0x313   :  { %v311_v45 = vpop.f32.mrb[2].mxu0 }
 0x314   :  { %v316_v46 = vrot.slane %v311_v45, 2  ;;  %v1565_v47 = vpop.f32.mrb[3].mxu0 }
 0x315   :  { %v545_v47 = vld [vmem:[#allocation2 + $0x80] sm:$0xff] }
 0x316   :  { %v318_v48 = vsub.f32 %v311_v45, %v316_v46  ;;  %v544_v45 = vld [vmem:[#allocation2 + $0x78] sm:$0xff] }
 0x317   :  { %v1700_v46 = vpack.c.bf16 %v544_v45, %v543_v43 }
 0x318   :  { %v319_v49 = vmul.f32 0.35355338, %v318_v48  ;;  %v546_v48 = vld [vmem:[#allocation2 + $0x88] sm:$0xff] }
 0x31a   :  { %v320_v50 = vand.u32 2147483647, %v319_v49  ;;  %vm324_vm13 = vcmp.ge.f32.partialorder %v319_v49, 0.0  ;;  %v1703_v49 = vpack.c.bf16 %v546_v48, %v545_v47  ;;  %v1462_v48 = vld [vmem:[#allocation2 + $0xf8] ss:$0 sm:$0xff] }
 0x31c   :  { %v321_v51 = vsub.f32 0.0, %v320_v50  ;;  %v1459_v50 = vld [vmem:[#allocation2 + $0x91] ss:$0 sm:$0xff] }
 0x31e   :  { %v322_v52 = vmul.f32 1.442695, %v321_v51 }
 0x320   :  { %1772 = vpow2.f32 %v322_v52 }
 0x32a   :  { %v1773_v53 = vpop.eup %1772 }
 0x32b   :  { %v325_v54 = vadd.f32 1.0, %v1773_v53 }
 0x32d   :  { %1774 = vrcp.f32 %v325_v54 }
 0x337   :  { %v1775_v58 = vpop.eup %1774 }
 0x338   :  { %v328_v63 = vmul.f32 %v1775_v58, %v1773_v53 }
 0x33a   :  { %v329_v2 = vsel %vm324_vm13, %v1775_v58, %v328_v63 }
 0x33b   :  { %1569 = vmatmul.mubr.msk.f32.vlgmr.msra.gmra.mrb[4].mxu0 %vm330_vm12, %v329_v2 }
 0x33c   :  { %1689 = vmatpush3.bf16.msra.mxu0 %v1688_v59  ;;  %1579 = vmatprep.mubr.msk.f32.mxu0 %vm1848_vm0, %v1847_v0 }
 0x33d   :  { %1690 = vmatprep.subr.bf16.mxu0 %v1849_v1 }
 0x340   :  { %1692 = vmatpush3.bf16.msra.mxu0 %v1691_v3 }
 0x341   :  { %1699 = vmatprep.subr.bf16.mxu0 %v1849_v1 }
 0x40e   :  { %v404_v4 = vpop.f32.mrb[4].mxu0 }
 0x40f   :  { %v412_v5 = vsub.f32 1.0, %v404_v4  ;;  %v1570_v6 = vpop.f32.mrb[5].mxu0  ;;  %v411_v9 = vmul.f32 %v409_v8, %v404_v4 }
 0x411   :  { %v416_v10 = vmul.f32 %v414_v7, %v412_v5 }
 0x413   :  { %v417_v11 = vadd.f32 %v416_v10, %v411_v9 }
 0x415   :  { %1580 = vmatmul.mubr.msk.f32.vlgmr.msra.gmra.mrb[6].mxu0 %vm147_vm2, %v417_v11 }
 0x416   :  { %1601 = vmatprep.mubr.msk.f32.mxu0 %vm1848_vm0, %v1847_v0  ;;  %1701 = vmatpush3.bf16.xpose.msra.mxu0 %v1700_v46 }
 0x417   :  { %1702 = vmatprep.subr.bf16.mxu0 %v1849_v1 }
 0x41e   :  { %1704 = vmatpush3.bf16.xpose.msra.mxu0 %v1703_v49 }
 0x41f   :  { %1626 = vmatprep.subr.mxu0 %v1847_v0 }
 0x4e8   :  { %v507_v14 = vpop.f32.mrb[6].mxu0 }
 0x4e9   :  { %v508_v15 = vadd.f32 %v507_v14, %v436_v12  ;;  %v1581_v16 = vpop.f32.mrb[7].mxu0 }
 0x4eb   :  { %v512_v17 = vadd.f32 %v508_v15, %v1897_v13 }
 0x4ed   :  { %v514_v18 = vsel %vm513_vm5, %v512_v17, 0.0 }
 0x4ee   :  { %515 = vadd.xlane.f32.xlu1 %v514_v18  ;;  %v1461_v18 = vld [vmem:[#allocation2 + $0x93] ss:$0 sm:$0xff] }
 0x57b   :  { %v516_v19 = vpop.xlane.xlu1 %515 }
 0x57c   :  { %v518_v20 = vmul.f32 0.03125, %v516_v19 }
 0x57e   :  { %v519_v21 = vsub.f32 %v512_v17, %v518_v20 }
 0x580   :  { %v520_v24 = vmul.f32 %v519_v21, %v519_v21 }
 0x582   :  { %v521_v25 = vsel %vm513_vm5, %v520_v24, 0.0 }
 0x583   :  { %522 = vadd.xlane.f32.xlu0 %v521_v25 }
 0x599   :  { %534 = vrot.lane.b32.xlu0 %v1969_v32, %s1853_s25 }
 0x59d   :  { %744 = vrot.lane.b32.xlu0 %v1969_v32, %s1850_s0 }
 0x610   :  { %v523_v13 = vpop.xlane.xlu0 %522 }
 0x611   :  { %v524_v36 = vmul.f32 0.03125, %v523_v13 }
 0x613   :  { %v525_v37 = vadd.f32 1e-05, %v524_v36  ;;  %v750_v36 = vld [vmem:[#allocation2 + $0xa8] sm:$0xff] }
 0x614   :  { %v535_v40 = vpop.permute.xlu0 %534 }
 0x615   :  { %1776 = vrsqrt.f32 %v525_v37  ;;  %v751_v37 = vld [vmem:[#allocation2 + $0xb0] sm:$0xff] }
 0x61f   :  { %v1777_v38 = vpop.eup %1776 }
 0x620   :  { %v527_v39 = vmul.f32 %v1777_v38, %v519_v21  ;;  %v1709_v38 = vpack.c.bf16 %v751_v37, %v750_v36 }
 0x622   :  { %v532_v41 = vmul.f32 %v1969_v32, %v527_v39 }
 0x624   :  { %v537_v42 = vadd.f32 %v535_v40, %v532_v41 }
 0x626   :  { %1591 = vmatmul.mubr.msk.f32.vlgmr.msra.gmra.mrb[2].mxu1 %vm147_vm2, %v537_v42 }
 0x627   :  { %1612 = vmatprep.mubr.msk.f32.mxu1 %vm1848_vm0, %v1847_v0 }
 0x6f9   :  { %v621_v51 = vpop.f32.mrb[2].mxu1 }
 0x6fa   :  { %v622_v52 = vadd.f32 %v1459_v50, %v621_v51  ;;  %v1592_v53 = vpop.f32.mrb[3].mxu1 }
 0x6fc   :  { %v626_v54 = vmul.f32 0.70710677, %v622_v52  ;;  %v625_v15 = vmul.f32 0.5, %v622_v52  ;;  %v1767_v52 = vpack.i.bf16 %v751_v37, %v750_v36 }
 0x6fe   :  { %v627_v55 = vand.u32 2147483647, %v626_v54  ;;  %vm647_vm6 = vcmp.ge.f32.partialorder %v626_v54, 0.0 }
 0x700   :  { %v628_v56 = vmul.f32 0.3275911, %v627_v55  ;;  %v641_v58 = vsub.f32 0.0, %v627_v55 }
 0x702   :  { %v629_v57 = vadd.f32 1.0, %v628_v56  ;;  %v642_v60 = vmul.f32 %v641_v58, %v627_v55 }
 0x704   :  { %1778 = vrcp.f32 %v629_v57  ;;  %v643_v63 = vmul.f32 1.442695, %v642_v60 }
 0x706   :  { %1780 = vpow2.f32 %v643_v63 }
 0x70e   :  { %v1779_v59 = vpop.eup %1778 }
 0x70f   :  { %v632_v61 = vmul.f32 1.0614054, %v1779_v59 }
 0x710   :  { %v1781_v9 = vpop.eup %1780 }
 0x711   :  { %v633_v62 = vadd.f32 -1.4531521, %v632_v61 }
 0x713   :  { %v634_v2 = vmul.f32 %v1779_v59, %v633_v62 }
 0x715   :  { %v635_v3 = vadd.f32 1.4214138, %v634_v2 }
 0x717   :  { %v636_v4 = vmul.f32 %v1779_v59, %v635_v3 }
 0x719   :  { %v637_v5 = vadd.f32 -0.28449672, %v636_v4 }
 0x71b   :  { %v638_v6 = vmul.f32 %v1779_v59, %v637_v5 }
 0x71d   :  { %v639_v7 = vadd.f32 0.2548296, %v638_v6 }
 0x71f   :  { %v640_v8 = vmul.f32 %v1779_v59, %v639_v7 }
 0x721   :  { %v645_v10 = vmul.f32 %v1781_v9, %v640_v8 }
 0x723   :  { %v646_v11 = vsub.f32 1.0, %v645_v10 }
 0x725   :  { %v648_v12 = vsub.f32 0.0, %v646_v11 }
 0x727   :  { %v649_v14 = vsel %vm647_vm6, %v646_v11, %v648_v12 }
 0x728   :  { %v650_v16 = vadd.f32 1.0, %v649_v14 }
 0x72a   :  { %v651_v17 = vmul.f32 %v650_v16, %v625_v15 }
 0x72c   :  { %1602 = vmatmul.mubr.f32.vlgmr.msra.gmra.mrb[8].mxu0 %v651_v17 }
 0x72d   :  { %1627 = vmatpush3.msk.msra.mxu0 %vm334_vm10, %v1953_v44  ;;  %1628 = vmatprep.mubr.msk.f32.mxu0 %vm1848_vm0, %v1847_v0  ;;  %v748_v44 = vld [vmem:[#allocation2 + $0x98] sm:$0xff] }
 0x72e   :  { %1723 = vmatprep.subr.bf16.mxu0 %v1849_v1  ;;  %v1706_v13 = vpack.c.bf16 %v749_v35, %v748_v44  ;;  %v1762_v28 = vpack.i.bf16 %v749_v35, %v748_v44 }
 0x730   :  { %1707 = vmatpush3.bf16.msra.mxu1 %v1706_v13 }
 0x731   :  { %1708 = vmatprep.subr.bf16.mxu1 %v1849_v1 }
 0x734   :  { %1710 = vmatpush3.bf16.msra.mxu1 %v1709_v38 }
 0x735   :  { %1711 = vmatprep.subr.bf16.mxu1 %v1849_v1 }
 0x7ff   :  { %v722_v19 = vpop.f32.mrb[8].mxu0 }
 0x800   :  { %v723_v20 = vadd.f32 %v1461_v18, %v722_v19  ;;  %v1603_v21 = vpop.f32.mrb[9].mxu0 }
 0x802   :  { %v726_v24 = vadd.f32 %v723_v20, %v537_v42 }
 0x804   :  { %v727_v25 = vsel %vm513_vm5, %v726_v24, 0.0 }
 0x805   :  { %728 = vadd.xlane.f32.xlu1 %v727_v25 }
 0x892   :  { %v729_v29 = vpop.xlane.xlu1 %728 }
 0x893   :  { %v730_v30 = vmul.f32 0.03125, %v729_v29 }
 0x895   :  { %v731_v31 = vsub.f32 %v726_v24, %v730_v30 }
 0x897   :  { %v732_v33 = vmul.f32 %v731_v31, %v731_v31 }
 0x899   :  { %v733_v34 = vsel %vm513_vm5, %v732_v33, 0.0 }
 0x89a   :  { %734 = vadd.xlane.f32.xlu1 %v733_v34 }
 0x8ab   :  { %740 = vrot.lane.b32.xlu1 %v1969_v32, %s1852_s1  ;;  %v745_v32 = vpop.permute.xlu0 %744 }
 0x927   :  { %v735_v39 = vpop.xlane.xlu1 %734 }
 0x928   :  { %v736_v40 = vmul.f32 0.03125, %v735_v39 }
 0x92a   :  { %v737_v41 = vadd.f32 1e-05, %v736_v40 }
 0x92b   :  { %v741_v43 = vpop.permute.xlu1 %740 }
 0x92c   :  { %1782 = vrsqrt.f32 %v737_v41  ;;  %v1138_v41 = vld [vmem:[#allocation2 + $0xb8] sm:$0xff] }
 0x936   :  { %v1783_v42 = vpop.eup %1782 }
 0x937   :  { %v739_v45 = vmul.f32 %v1783_v42, %v731_v31  ;;  %v1139_v42 = vld [vmem:[#allocation2 + $0xc0] sm:$0xff] }
 0x939   :  { %v743_v46 = vmul.f32 %v741_v43, %v739_v45  ;;  %v1140_v43 = vld [vmem:[#allocation2 + $0xc8] sm:$0xff]  ;;  %v2037_v45 = vld [vmem:[#allocation2 + $0xfa] ss:$0 sm:$0xff] }
 0x93b   :  { %v1994_v47 = vadd.f32 %v745_v32, %v743_v46  ;;  %v1724_v32 = vpack.c.bf16 %v1139_v42, %v1138_v41  ;;  %v1141_v46 = vld [vmem:[#allocation2 + $0xd0] sm:$0xff]  ;;  %v1350_v42 = vld [vmem:[#allocation2 + $0x20] sm:$0xff] }
 0x93d   :  { %1613 = vmatmul.mubr.msk.f32.vlgmr.msra.gmra.mrb[4].mxu1 %vm147_vm2, %v1994_v47 }
 0x93e   :  { %1713 = vmatpush3.bf16.msk.msra.mxu1 %vm1682_vm9, %v1851_v26  ;;  %1623 = vmatprep.mubr.msk.f32.mxu1 %vm1848_vm0, %v1847_v0 }
 0x93f   :  { %1714 = vmatprep.subr.bf16.mxu1 %v1849_v1 }
 0x942   :  { %1716 = vmatpush3.bf16.msk.msra.mxu1 %vm1685_vm1, %v1851_v26 }
 0x943   :  { %1717 = vmatprep.subr.bf16.mxu1 %v1849_v1 }
 0xa10   :  { %v826_v23 = vpop.f32.mrb[4].mxu1 }
 0xa11   :  { %v827_v49 = vadd.f32 %v1462_v48, %v826_v23  ;;  %v1614_v22 = vpop.f32.mrb[5].mxu1 }
 0xa13   :  { %836 = vrot.lane.b32.xlu1 %v827_v49, %s1853_s25  ;;  %v831_v50 = vrot.slane %v827_v49, 1  ;;  %v833_v51 = vrot.slane %v827_v49, 7 }
 0xa15   :  { %v835_v53 = vsel %vm226_vm3, %v831_v50, %v833_v51 }
 0xa16   :  { %841 = vrot.lane.b32.xlu0 %v835_v53, %s1853_s25 }
 0xa17   :  { %1768 = vrot.lane.b32.xlu1 %v1767_v52, %s1850_s0 }
 0xa1a   :  { %1763 = vrot.lane.b32.xlu0 %v1762_v28, %s1850_s0  ;;  %v1143_v28 = vld [vmem:[#allocation2 + $0xd8] sm:$0xff] }
 0xa1b   :  { %1015 = vrot.lane.b32.xlu1 %v835_v53, %s1852_s1 }
 0xa1e   :  { %1010 = vrot.lane.b32.xlu0 %v827_v49, %s1852_s1 }
 0xa22   :  { %1037 = vrot.lane.b32.xlu0 %v1462_v48, %s1850_s0  ;;  %v1727_v48 = vpack.c.bf16 %v1141_v46, %v1140_v43  ;;  %v1351_v43 = vld [vmem:[#allocation2 + $0x28] sm:$0xff] }
 0xa85   :  { %v837_v26 = vpop.permute.xlu1 %836 }
 0xa86   :  { %v839_v55 = vmul.f32 %v837_v26, %v827_v49  ;;  %v1144_v26 = vld [vmem:[#allocation2 + $0xe0] sm:$0xff] }
 0xa88   :  { %v842_v27 = vpop.permute.xlu0 %841 }
 0xa89   :  { %v844_v54 = vmul.f32 %v842_v27, %v827_v49  ;;  %v1769_v57 = vpop.permute.xlu1 %1768  ;;  %v1730_v27 = vpack.c.bf16 %v1144_v26, %v1143_v28 }
 0xa8a   :  { %v1771_v58 = vunpack.i.h.bf16 %v1769_v57  ;;  %v1770_v61 = vunpack.i.l.bf16 %v1769_v57  ;;  %v1473_v57 = vld [vmem:[#allocation2 + $0xf9] ss:$0 sm:$0xff] }
 0xa8b   :  { %v846_v56 = vrot.slane %v844_v54, 6  ;;  %v1145_v54 = vld [vmem:[#allocation2 + $0xe8] sm:$0xff] }
 0xa8c   :  { %v1764_v59 = vpop.permute.xlu0 %1763  ;;  %v1721_v3 = vpack.c.bf16 %v1771_v58, %v1770_v61 }
 0xa8d   :  { %v848_v60 = vsel %vm240_vm4, %v839_v55, %v846_v56  ;;  %v1766_v62 = vunpack.i.h.bf16 %v1764_v59  ;;  %v1765_v63 = vunpack.i.l.bf16 %v1764_v59  ;;  %v1016_v21 = vpop.permute.xlu1 %1015  ;;  %v1146_v55 = vld [vmem:[#allocation2 + $0xf0] sm:$0xff] }
 0xa8e   :  { %1624 = vmatmul.mubr.msk.f32.vlgmr.msra.gmra.mrb[6].mxu1 %vm147_vm2, %v848_v60  ;;  %v1733_v56 = vpack.c.bf16 %v1146_v55, %v1145_v54 }
 0xa8f   :  { %v1718_v2 = vpack.c.bf16 %v1766_v62, %v1765_v63  ;;  %1639 = vmatprep.mubr.msk.f32.mxu1 %vm1848_vm0, %v1847_v0 }
 0xa90   :  { %v1011_v24 = vpop.permute.xlu0 %1010 }
 0xa91   :  { %1719 = vmatpush3.bf16.msra.mxu1 %v1718_v2 }
 0xa92   :  { %1720 = vmatprep.subr.bf16.mxu1 %v1849_v1 }
 0xa94   :  { %v1038_v31 = vpop.permute.xlu0 %1037 }
 0xa95   :  { %1722 = vmatpush3.bf16.msra.mxu1 %v1721_v3 }
 0xa96   :  { %1729 = vmatprep.subr.bf16.mxu1 %v1849_v1 }
 0xb61   :  { %v918_v4 = vpop.f32.mrb[6].mxu1 }
 0xb62   :  { %v923_v5 = vrot.slane %v918_v4, 2  ;;  %v1625_v6 = vpop.f32.mrb[7].mxu1 }
 0xb64   :  { %v925_v7 = vsub.f32 %v918_v4, %v923_v5 }
 0xb66   :  { %v926_v8 = vmul.f32 0.35355338, %v925_v7 }
 0xb68   :  { %v927_v9 = vand.u32 2147483647, %v926_v8  ;;  %vm931_vm7 = vcmp.ge.f32.partialorder %v926_v8, 0.0 }
 0xb6a   :  { %v928_v10 = vsub.f32 0.0, %v927_v9 }
 0xb6c   :  { %v929_v11 = vmul.f32 1.442695, %v928_v10 }
 0xb6e   :  { %1784 = vpow2.f32 %v929_v11 }
 0xb78   :  { %v1785_v12 = vpop.eup %1784 }
 0xb79   :  { %v932_v14 = vadd.f32 1.0, %v1785_v12 }
 0xb7b   :  { %1786 = vrcp.f32 %v932_v14 }
 0xb85   :  { %v1787_v15 = vpop.eup %1786 }
 0xb86   :  { %v935_v16 = vmul.f32 %v1787_v15, %v1785_v12 }
 0xb88   :  { %v936_v17 = vsel %vm931_vm7, %v1787_v15, %v935_v16 }
 0xb89   :  { %1629 = vmatmul.mubr.msk.f32.vlgmr.msra.gmra.mrb[10].mxu0 %vm330_vm12, %v936_v17 }
 0xb8a   :  { %1650 = vmatprep.mubr.msk.f32.mxu0 %vm1848_vm0, %v1847_v0  ;;  %1725 = vmatpush3.bf16.msra.mxu0 %v1724_v32  ;;  %v1739_v32 = vpack.c.bf16 %v1351_v43, %v1350_v42 }
 0xb8b   :  { %1726 = vmatprep.subr.bf16.mxu0 %v1849_v1 }
 0xb8e   :  { %1728 = vmatpush3.bf16.msra.mxu0 %v1727_v48 }
 0xb8f   :  { %1735 = vmatprep.subr.bf16.mxu0 %v1849_v1 }
 0xc5c   :  { %v1006_v18 = vpop.f32.mrb[10].mxu0 }
 0xc5d   :  { %v1014_v19 = vsub.f32 1.0, %v1006_v18  ;;  %v1630_v20 = vpop.f32.mrb[11].mxu0  ;;  %v1013_v25 = vmul.f32 %v1011_v24, %v1006_v18 }
 0xc5f   :  { %v1018_v29 = vmul.f32 %v1016_v21, %v1014_v19 }
 0xc61   :  { %v1019_v30 = vadd.f32 %v1018_v29, %v1013_v25  ;;  %v1475_v29 = vld [vmem:[#allocation2 + $0xfb] ss:$0 sm:$0xff] }
 0xc63   :  { %1640 = vmatmul.mubr.msk.f32.vlgmr.msra.gmra.mrb[8].mxu1 %vm147_vm2, %v1019_v30 }
 0xc64   :  { %1661 = vmatprep.mubr.msk.f32.mxu1 %vm1848_vm0, %v1847_v0  ;;  %1731 = vmatpush3.bf16.xpose.msra.mxu1 %v1730_v27 }
 0xc65   :  { %1732 = vmatprep.subr.bf16.mxu1 %v1849_v1 }
 0xc6c   :  { %1734 = vmatpush3.bf16.xpose.msra.mxu1 %v1733_v56 }
 0xd36   :  { %v1109_v33 = vpop.f32.mrb[8].mxu1 }
 0xd37   :  { %v1110_v34 = vadd.f32 %v1109_v33, %v1038_v31  ;;  %v1641_v44 = vpop.f32.mrb[9].mxu1 }
 0xd39   :  { %v1114_v35 = vadd.f32 %v1110_v34, %v1994_v47 }
 0xd3b   :  { %v1115_v13 = vsel %vm513_vm5, %v1114_v35, 0.0 }
 0xd3c   :  { %1116 = vadd.xlane.f32.xlu1 %v1115_v13 }
 0xdc9   :  { %v1117_v36 = vpop.xlane.xlu1 %1116 }
 0xdca   :  { %v1118_v37 = vmul.f32 0.03125, %v1117_v36 }
 0xdcc   :  { %v1119_v38 = vsub.f32 %v1114_v35, %v1118_v37 }
 0xdce   :  { %v1120_v39 = vmul.f32 %v1119_v38, %v1119_v38 }
 0xdd0   :  { %v1121_v40 = vsel %vm513_vm5, %v1120_v39, 0.0  ;;  %v1348_v39 = vld [vmem:[#allocation2 + $0x10] sm:$0xff] }
 0xdd1   :  { %1122 = vadd.xlane.f32.xlu0 %v1121_v40  ;;  %v1349_v40 = vld [vmem:[#allocation2 + $0x18] sm:$0xff] }
 0xdd2   :  { %v1736_v41 = vpack.c.bf16 %v1349_v40, %v1348_v39 }
 0xde7   :  { %1134 = vrot.lane.b32.xlu0 %v2037_v45, %s1853_s25 }
 0xdeb   :  { %1344 = vrot.lane.b32.xlu0 %v2037_v45, %s1850_s0 }
 0xe5e   :  { %v1123_v47 = vpop.xlane.xlu0 %1122 }
 0xe5f   :  { %v1124_v23 = vmul.f32 0.03125, %v1123_v47 }
 0xe61   :  { %v1125_v49 = vadd.f32 1e-05, %v1124_v23 }
 0xe62   :  { %v1135_v51 = vpop.permute.xlu0 %1134 }
 0xe63   :  { %1788 = vrsqrt.f32 %v1125_v49 }
 0xe6d   :  { %v1789_v22 = vpop.eup %1788 }
 0xe6e   :  { %v1127_v50 = vmul.f32 %v1789_v22, %v1119_v38 }
 0xe70   :  { %v1132_v52 = vmul.f32 %v2037_v45, %v1127_v50  ;;  %v1345_v50 = vpop.permute.xlu0 %1344 }
 0xe72   :  { %v1137_v53 = vadd.f32 %v1135_v51, %v1132_v52  ;;  %v1476_v52 = vld [vmem:[#allocation2 + $0x9] ss:$0 sm:$0xff] }
 0xe74   :  { %1651 = vmatmul.mubr.msk.f32.vlgmr.msra.gmra.mrb[12].mxu0 %vm147_vm2, %v1137_v53 }
 0xe75   :  { %1672 = vmatprep.mubr.msk.f32.mxu0 %vm1848_vm0, %v1847_v0  ;;  %1737 = vmatpush3.bf16.msra.mxu0 %v1736_v41 }
 0xe76   :  { %1738 = vmatprep.subr.bf16.mxu0 %v1849_v1 }
 0xe79   :  { %1740 = vmatpush3.bf16.msra.mxu0 %v1739_v32 }
 0xf47   :  { %v1221_v58 = vpop.f32.mrb[12].mxu0 }
 0xf48   :  { %v1222_v59 = vadd.f32 %v1473_v57, %v1221_v58  ;;  %v1652_v60 = vpop.f32.mrb[13].mxu0 }
 0xf4a   :  { %v1226_v61 = vmul.f32 0.70710677, %v1222_v59  ;;  %v1225_v21 = vmul.f32 0.5, %v1222_v59 }
 0xf4c   :  { %v1227_v62 = vand.u32 2147483647, %v1226_v61  ;;  %vm1247_vm0 = vcmp.ge.f32.partialorder %v1226_v61, 0.0 }
 0xf4e   :  { %v1228_v63 = vmul.f32 0.3275911, %v1227_v62  ;;  %v1241_v0 = vsub.f32 0.0, %v1227_v62 }
 0xf50   :  { %v1229_v2 = vadd.f32 1.0, %v1228_v63  ;;  %v1242_v4 = vmul.f32 %v1241_v0, %v1227_v62 }
 0xf52   :  { %1790 = vrcp.f32 %v1229_v2  ;;  %v1243_v7 = vmul.f32 1.442695, %v1242_v4 }
 0xf54   :  { %1792 = vpow2.f32 %v1243_v7 }
 0xf5c   :  { %v1791_v3 = vpop.eup %1790 }
 0xf5d   :  { %v1232_v5 = vmul.f32 1.0614054, %v1791_v3 }
 0xf5e   :  { %v1793_v16 = vpop.eup %1792 }
 0xf5f   :  { %v1233_v6 = vadd.f32 -1.4531521, %v1232_v5 }
 0xf61   :  { %v1234_v8 = vmul.f32 %v1791_v3, %v1233_v6 }
 0xf63   :  { %v1235_v9 = vadd.f32 1.4214138, %v1234_v8 }
 0xf65   :  { %v1236_v10 = vmul.f32 %v1791_v3, %v1235_v9 }
 0xf67   :  { %v1237_v11 = vadd.f32 -0.28449672, %v1236_v10 }
 0xf69   :  { %v1238_v12 = vmul.f32 %v1791_v3, %v1237_v11 }
 0xf6b   :  { %v1239_v14 = vadd.f32 0.2548296, %v1238_v12 }
 0xf6d   :  { %v1240_v15 = vmul.f32 %v1791_v3, %v1239_v14 }
 0xf6f   :  { %v1245_v17 = vmul.f32 %v1793_v16, %v1240_v15 }
 0xf71   :  { %v1246_v18 = vsub.f32 1.0, %v1245_v17 }
 0xf73   :  { %v1248_v19 = vsub.f32 0.0, %v1246_v18 }
 0xf75   :  { %v1249_v20 = vsel %vm1247_vm0, %v1246_v18, %v1248_v19 }
 0xf76   :  { %v1250_v24 = vadd.f32 1.0, %v1249_v20 }
 0xf78   :  { %v1251_v25 = vmul.f32 %v1250_v24, %v1225_v21 }
 0xf7a   :  { %1662 = vmatmul.mubr.f32.vlgmr.msra.gmra.mrb[10].mxu1 %v1251_v25 }
0x104d   :  { %v1322_v30 = vpop.f32.mrb[10].mxu1 }
0x104e   :  { %v1323_v31 = vadd.f32 %v1475_v29, %v1322_v30  ;;  %v1663_v33 = vpop.f32.mrb[11].mxu1 }
0x1050   :  { %v1326_v34 = vadd.f32 %v1323_v31, %v1137_v53 }
0x1052   :  { %v1327_v44 = vsel %vm513_vm5, %v1326_v34, 0.0 }
0x1053   :  { %1328 = vadd.xlane.f32.xlu1 %v1327_v44 }
0x10e0   :  { %v1329_v35 = vpop.xlane.xlu1 %1328 }
0x10e1   :  { %v1330_v13 = vmul.f32 0.03125, %v1329_v35 }
0x10e3   :  { %v1331_v36 = vsub.f32 %v1326_v34, %v1330_v13 }
0x10e5   :  { %v1332_v37 = vmul.f32 %v1331_v36, %v1331_v36 }
0x10e7   :  { %v1333_v38 = vsel %vm513_vm5, %v1332_v37, 0.0 }
0x10e8   :  { %1334 = vadd.xlane.f32.xlu1 %v1333_v38 }
0x10f9   :  { %1340 = vrot.lane.b32.xlu1 %v2037_v45, %s1852_s1 }
0x1175   :  { %v1335_v46 = vpop.xlane.xlu1 %1334 }
0x1176   :  { %v1336_v48 = vmul.f32 0.03125, %v1335_v46 }
0x1178   :  { %v1337_v47 = vadd.f32 1e-05, %v1336_v48 }
0x1179   :  { %v1341_v49 = vpop.permute.xlu1 %1340 }
0x117a   :  { %1794 = vrsqrt.f32 %v1337_v47 }
0x1184   :  { %v1795_v23 = vpop.eup %1794 }
0x1185   :  { %v1339_v22 = vmul.f32 %v1795_v23, %v1331_v36 }
0x1187   :  { %v1343_v51 = vmul.f32 %v1341_v49, %v1339_v22 }
0x1189   :  { %v1347_v45 = vadd.f32 %v1345_v50, %v1343_v51 }
0x118b   :  { %1673 = vmatmul.mubr.msk.f32.vlgmr.msra.gmra.mrb[14].mxu0 %vm147_vm2, %v1347_v45 }
0x125e   :  { %v1426_v1 = vpop.f32.mrb[14].mxu0 }
0x125f   :  { %v1427_v53 = vadd.f32 %v1476_v52, %v1426_v1  ;;  %v1674_v28 = vpop.f32.mrb[15].mxu0 }
0x1261   :  { %1430 = vst [vmem:[#allocation5] sm:$0x3] %v1427_v53 }
0x1262   :  { %1829 = shalt.err (!%p1826_p12)
}
0x1263   :  { %s1830_s3 = scalar_lea.hbm %s2070_s2, 32 }
0x1264   :  { %p1831_p13 = scmp.ne.s32.totalorder %s2070_s2, %s1830_s3  ;;  %p1834_p0 = scmp.lt.u32.totalorder %s1830_s3, %s2070_s2 }
0x1266   :  { %p1836_p1 = pnand %p1834_p0, %p1831_p13 }
0x1268   :  { %1839 = shalt.err (!%p1836_p1)
}
0x1269   :  { %1440 = dma.vmem_to_hbm [thread:$0]  %s1438_s27, 32, %s2070_s2, [#allocation4]  }
0x126a   :  { %1842 = dma.done.wait [#allocation4], 32  }
0x126b   :  { %1843 = vsyncadd [#allocation4], 4294967264 }
0x126c   :  { %1444 = vsyncpa [#allocation3], 1 }
0x126d   :  { %1445 = vsyncpa [#allocation4], 1 }

</bundles_post_ra>
